<compile_context>
chip_gen: v7x
topology: tpu7x:2x2x1
jax: 0.10.0
libtpu: 0.0.40
codegen_flags: <defaults>
</compile_context>

<pallas_src>
import functools

import jax
import jax.numpy as jnp
from jax import lax
from jax.experimental import pallas as pl
from jax.experimental.pallas import tpu as pltpu


def _round_up(x, m):
    return (x + m - 1) // m * m


# ---------------------------------------------------------------------------
# Fused MBBlock kernel (Nb images per grid step, channels-first flat layout).
# ---------------------------------------------------------------------------
def _make_fused_kernel(*, K, dilation, Wp, Lc, use_residual, res_off, vpu_pw_max_k=64):
    # Row-major (kh, kw) tap order: must match the (K, K, Cmid) wdw layout in the wrapper.
    taps = [(kh, kw) for kh in range(K) for kw in range(K)]

    def pointwise(w_ref, x):
        # 1x1 conv: (Co, Ck) @ (Ck, L) with BN scale already folded into w.
        # Tiny contraction dims -> unrolled VPU MAC (MXU would be pure push/pop
        # overhead); larger Ck -> MXU.  Crossover ~64 on v5e, ~128 on v6e/v7x.
        ck = w_ref.shape[1]
        if ck <= vpu_pw_max_k:
            w = w_ref[...]
            acc = w[:, 0:1] * x[0:1, :]
            for k in range(1, ck):
                acc = acc + w[:, k:k + 1] * x[k:k + 1, :]
            return acc
        return jnp.dot(w_ref[...], x, preferred_element_type=jnp.float32)

    def kernel(x_ref, w1_ref, b1_ref, wdw_ref, b2_ref, w3_ref, b3_ref, mask_ref, o_ref):
        x = x_ref[...]                                     # (Cin, Nb*Wflat), lane-dense

        # --- stage 1: 1x1 expand + BN shift + ReLU; mask zeroes pad ring & image tails ---
        h1 = pointwise(w1_ref, x)                          # (Cmid, Nb*Wflat)
        h1 = jnp.maximum(h1 + b1_ref[...], 0.0) * mask_ref[...]

        # --- stage 2: KxK depthwise on the flat padded grid (dense, stride 1).
        #     Each tap is a lane-offset slice; per-channel weight is a (Cmid, 1)
        #     column broadcast along lanes.  Taps never cross an image boundary
        #     for lanes that survive the wrapper's discard slice. ---
        acc = None
        for t, (kh, kw) in enumerate(taps):
            off = (kh * Wp + kw) * dilation
            term = h1[:, off:off + Lc] * wdw_ref[:, t:t + 1]
            acc = term if acc is None else acc + term
        h2 = jnp.maximum(acc + b2_ref[...], 0.0)           # (Cmid, Lc)

        # --- stage 3: 1x1 project + BN shift (+ fused residual) ---
        out = pointwise(w3_ref, h2) + b3_ref[...]          # (Cout, Lc)
        if use_residual:
            out = out + x[:, res_off:res_off + Lc]
        # Partial store: the final `maxoff` lanes of the block are never valid
        # outputs (always discarded by the wrapper), so they are left unwritten.
        o_ref[:, :Lc] = out.astype(o_ref.dtype)

    return kernel


# ---------------------------------------------------------------------------
# MBBlock forward (wrapper: NCHW in / NCHW out, like PyTorch).
# ---------------------------------------------------------------------------
def _fold_bn(gamma, beta, mean, var, eps=1e-5):
    scale = gamma / jnp.sqrt(var + eps)
    shift = beta - mean * scale
    return scale.astype(jnp.float32), shift.astype(jnp.float32)


def mbblock_forward(x_nchw, params, *, kernel_size, stride, dilation,
                    vmem_target_bytes=8 << 20):
    N, Cin, H, W = x_nchw.shape
    K, d = kernel_size, dilation
    Cmid = params["w1"].shape[1]
    Cout = params["w3"].shape[1]
    pad = (K - 1) * d // 2
    Hp, Wp = H + 2 * pad, W + 2 * pad

    # Dense (stride-1) valid extents on the padded grid; strided output extents
    # (PyTorch conv arithmetic).
    Ho1, Wo1 = Hp - (K - 1) * d, Wp - (K - 1) * d
    Ho = (H + 2 * pad - d * (K - 1) - 1) // stride + 1
    Wo = (W + 2 * pad - d * (K - 1) - 1) // stride + 1
    use_residual = (Cin == Cout) and (stride == 1)

    # Per-image flat length rounded to a 128-lane multiple; largest tap offset.
    Wflat = _round_up(Hp * Wp, 128)
    maxoff = (K - 1) * d * (Wp + 1)

    # How many images per grid step: keep the per-step working set
    # (double-buffered x/out blocks + h1/h2/temps + mask) around vmem_target_bytes.
    bytes_per_lane = 4 * (2 * Cin + 2 * Cout + 4 * Cmid + 2)
    lane_budget = max(Wflat, (vmem_target_bytes // bytes_per_lane) // 128 * 128)
    Nb = max(1, min(N, lane_budget // Wflat))
    num_steps = pl.cdiv(N, Nb)
    Npad = num_steps * Nb
    total = Nb * Wflat            # lanes per grid step (multiple of 128)
    Lc = total - maxoff           # lanes of dense depthwise output computed per step

    # Fold BN scale into the conv weights (exact in f32); keep only the shifts.
    s1, b1 = _fold_bn(params["bn1_g"], params["bn1_b"], params["bn1_m"], params["bn1_v"])
    s2, b2 = _fold_bn(params["bn2_g"], params["bn2_b"], params["bn2_m"], params["bn2_v"])
    s3, b3 = _fold_bn(params["bn3_g"], params["bn3_b"], params["bn3_m"], params["bn3_v"])
    w1s = (params["w1"].astype(jnp.float32) * s1).T                           # (Cmid, Cin)
    wdws = (params["wdw"].astype(jnp.float32) * s2).reshape(K * K, Cmid).T    # (Cmid, K*K)
    w3s = (params["w3"].astype(jnp.float32) * s3).T                           # (Cout, Cmid)
    b1c, b2c, b3c = b1.reshape(Cmid, 1), b2.reshape(Cmid, 1), b3.reshape(Cout, 1)

    # Lay out x channels-first with images concatenated along the flat lane axis:
    # (N, Cin, H, W) -> pad batch+spatial -> (Cin, Npad*Wflat).
    xp = jnp.pad(x_nchw.astype(jnp.float32),
                 ((0, Npad - N), (0, 0), (pad, pad), (pad, pad)))
    xf = jnp.pad(xp.reshape(Npad, Cin, Hp * Wp),
                 ((0, 0), (0, 0), (0, Wflat - Hp * Wp)))
    xf = jnp.transpose(xf, (1, 0, 2)).reshape(Cin, Npad * Wflat)

    # {0,1} mask reproducing conv2's zero-padding of h1 (also zeroes the per-image
    # flat tail lanes), tiled for the Nb images of one grid step.
    mrow = jnp.pad(jnp.ones((H, W), jnp.float32), ((pad, pad), (pad, pad))).reshape(-1)
    mrow = jnp.pad(mrow, (0, Wflat - Hp * Wp))
    mask = jnp.tile(mrow, (Nb,)).reshape(1, total)

    kernel = _make_fused_kernel(K=K, dilation=d, Wp=Wp, Lc=Lc,
                                use_residual=use_residual, res_off=pad * Wp + pad)

    out_flat = pl.pallas_call(
        kernel,
        out_shape=jax.ShapeDtypeStruct((Cout, Npad * Wflat), jnp.float32),
        grid=(num_steps,),
        in_specs=[
            pl.BlockSpec((Cin, total), lambda s: (0, s)),     # x (padded, flat, Nb images)
            pl.BlockSpec((Cmid, Cin), lambda s: (0, 0)),      # w1 (BN scale folded)
            pl.BlockSpec((Cmid, 1), lambda s: (0, 0)),        # bn1 shift
            pl.BlockSpec((Cmid, K * K), lambda s: (0, 0)),    # depthwise w (BN scale folded)
            pl.BlockSpec((Cmid, 1), lambda s: (0, 0)),        # bn2 shift
            pl.BlockSpec((Cout, Cmid), lambda s: (0, 0)),     # w3 (BN scale folded)
            pl.BlockSpec((Cout, 1), lambda s: (0, 0)),        # bn3 shift
            pl.BlockSpec((1, total), lambda s: (0, 0)),       # padding mask
        ],
        out_specs=pl.BlockSpec((Cout, total), lambda s: (0, s)),
        compiler_params=pltpu.CompilerParams(
            dimension_semantics=("parallel",),
            # Working set is sized to ~vmem_target_bytes; 64 MiB is ample on every
            # generation and does not exceed v7x's physical VMEM.
            vmem_limit_bytes=64 * 1024 * 1024),
    )(xf, w1s, b1c, wdws, b2c, w3s, b3c, mask)

    # Un-flatten: (Cout, Npad, Wflat) -> drop batch pad & per-image tail -> (Cout, N, Hp, Wp);
    # keep the dense-valid region (rows < Ho1, cols < Wo1) via the stride subsample + crop.
    out = out_flat.reshape(Cout, Npad, Wflat)[:, :N, :Hp * Wp].reshape(Cout, N, Hp, Wp)
    out = out[:, :, ::stride, ::stride][:, :, :Ho, :Wo]
    return jnp.transpose(out, (1, 0, 2, 3))


# ---------------------------------------------------------------------------
# Pure-JAX reference (eval-mode BN) for a correctness check.
# ---------------------------------------------------------------------------
def mbblock_reference(x_nchw, params, *, kernel_size, stride, dilation):
    x = jnp.transpose(x_nchw, (0, 2, 3, 1)).astype(jnp.float32)
    s1, b1 = _fold_bn(params["bn1_g"], params["bn1_b"], params["bn1_m"], params["bn1_v"])
    s2, b2 = _fold_bn(params["bn2_g"], params["bn2_b"], params["bn2_m"], params["bn2_v"])
    s3, b3 = _fold_bn(params["bn3_g"], params["bn3_b"], params["bn3_m"], params["bn3_v"])
    Cin = x.shape[-1]
    Cmid = params["w1"].shape[1]
    Cout = params["w3"].shape[1]
    pad = (kernel_size - 1) * dilation // 2

    h1 = jnp.maximum(jnp.einsum("nhwc,cd->nhwd", x, params["w1"]) * s1 + b1, 0.0)
    dw = params["wdw"].reshape(kernel_size, kernel_size, 1, Cmid)  # HWIO, feature groups
    h2 = lax.conv_general_dilated(
        h1, dw, window_strides=(stride, stride), padding=((pad, pad), (pad, pad)),
        rhs_dilation=(dilation, dilation), feature_group_count=Cmid,
        dimension_numbers=("NHWC", "HWIO", "NHWC"))
    h2 = jnp.maximum(h2 * s2 + b2, 0.0)
    out = jnp.einsum("nhwc,cd->nhwd", h2, params["w3"]) * s3 + b3
    if Cin == Cout and stride == 1:
        out = out + x
    return jnp.transpose(out, (0, 3, 1, 2))


# ---------------------------------------------------------------------------
if __name__ == "__main__":
    # Module config (small, consistent with MBBlock.__init__): in=4, out=4,
    # expansion=4 -> mid=16, stride=1, kernel=3, dilation=1, groups=1.
    N, Cin, H, W = 2, 4, 16, 16
    expansion, kernel_size, stride, dilation = 4, 3, 1, 1
    Cmid = Cin * expansion
    Cout = 4

    key = jax.random.PRNGKey(0)
    k_x, k_w1, k_wdw, k_w3 = jax.random.split(key, 4)

    x = jax.random.normal(k_x, (N, Cin, H, W), dtype=jnp.float32)

    # Parameter init mirroring the PyTorch __init__:
    #   conv weights ~ N(0, 1/weight.shape[1]); BN: gamma=1, beta=1e-4, mean=0, var=1.
    params = {
        "w1": jax.random.normal(k_w1, (Cin, Cmid), jnp.float32) * (1.0 / Cin),
        "wdw": jax.random.normal(k_wdw, (kernel_size, kernel_size, Cmid), jnp.float32) * 1.0,
        "w3": jax.random.normal(k_w3, (Cmid, Cout), jnp.float32) * (1.0 / Cmid),
        "bn1_g": jnp.ones((Cmid,)), "bn1_b": jnp.full((Cmid,), 1e-4),
        "bn1_m": jnp.zeros((Cmid,)), "bn1_v": jnp.ones((Cmid,)),
        "bn2_g": jnp.ones((Cmid,)), "bn2_b": jnp.full((Cmid,), 1e-4),
        "bn2_m": jnp.zeros((Cmid,)), "bn2_v": jnp.ones((Cmid,)),
        "bn3_g": jnp.ones((Cout,)), "bn3_b": jnp.full((Cout,), 1e-4),
        "bn3_m": jnp.zeros((Cout,)), "bn3_v": jnp.ones((Cout,)),
    }

    fwd = functools.partial(mbblock_forward, kernel_size=kernel_size,
                            stride=stride, dilation=dilation)
    out = jax.jit(fwd)(x, params)
    out = jax.block_until_ready(out)

    ref = mbblock_reference(x, params, kernel_size=kernel_size,
                            stride=stride, dilation=dilation)
    assert out.shape == (N, Cout, H, W), out.shape
    assert jnp.allclose(out, ref, rtol=1e-3, atol=1e-3), float(jnp.max(jnp.abs(out - ref)))

    print("KERNEL_OK")
</pallas_src>

<mosaic_0001>
module attributes {stable_mosaic.version = 11 : i64} {
  func.func @kernel(%arg0: i32, %arg1: memref<4x768xf32, #tpu.memory_space<vmem>>, %arg2: memref<16x4xf32, #tpu.memory_space<vmem>>, %arg3: memref<16x1xf32, #tpu.memory_space<vmem>>, %arg4: memref<16x9xf32, #tpu.memory_space<vmem>>, %arg5: memref<16x1xf32, #tpu.memory_space<vmem>>, %arg6: memref<4x16xf32, #tpu.memory_space<vmem>>, %arg7: memref<4x1xf32, #tpu.memory_space<vmem>>, %arg8: memref<1x768xf32, #tpu.memory_space<vmem>>, %arg9: memref<4x768xf32, #tpu.memory_space<vmem>>) attributes {dimension_semantics = [#tpu.dimension_semantics<parallel>], iteration_bounds = array<i64: 1>, scalar_prefetch = 0 : i64, scratch_operands = 0 : i64, tpu.core_type = #tpu.core_type<tc>, window_params = [{transform_indices = @transform_0, window_bounds = array<i64: 4, 768>}, {pipeline_mode = #tpu.pipeline_mode<synchronous>, transform_indices = @transform_1, window_bounds = array<i64: 16, 4>}, {pipeline_mode = #tpu.pipeline_mode<synchronous>, transform_indices = @transform_2, window_bounds = array<i64: 16, 1>}, {pipeline_mode = #tpu.pipeline_mode<synchronous>, transform_indices = @transform_3, window_bounds = array<i64: 16, 9>}, {pipeline_mode = #tpu.pipeline_mode<synchronous>, transform_indices = @transform_4, window_bounds = array<i64: 16, 1>}, {pipeline_mode = #tpu.pipeline_mode<synchronous>, transform_indices = @transform_5, window_bounds = array<i64: 4, 16>}, {pipeline_mode = #tpu.pipeline_mode<synchronous>, transform_indices = @transform_6, window_bounds = array<i64: 4, 1>}, {pipeline_mode = #tpu.pipeline_mode<synchronous>, transform_indices = @transform_7, window_bounds = array<i64: 1, 768>}, {transform_indices = @transform_8, window_bounds = array<i64: 4, 768>}]} {
    %c0 = arith.constant 0 : index
    %c0_0 = arith.constant 0 : index
    %0 = vector.load %arg1[%c0, %c0_0] : memref<4x768xf32, #tpu.memory_space<vmem>>, vector<4x768xf32>
    %c0_1 = arith.constant 0 : index
    %c0_2 = arith.constant 0 : index
    %1 = vector.load %arg2[%c0_1, %c0_2] : memref<16x4xf32, #tpu.memory_space<vmem>>, vector<16x4xf32>
    %2 = vector.extract_strided_slice %1 {offsets = [0, 0], sizes = [16, 1], strides = [1, 1]} : vector<16x4xf32> to vector<16x1xf32>
    %3 = vector.extract_strided_slice %0 {offsets = [0, 0], sizes = [1, 768], strides = [1, 1]} : vector<4x768xf32> to vector<1x768xf32>
    %4 = vector.broadcast %2 : vector<16x1xf32> to vector<16x768xf32>
    %5 = vector.broadcast %3 : vector<1x768xf32> to vector<16x768xf32>
    %6 = arith.mulf %4, %5 : vector<16x768xf32>
    %7 = vector.extract_strided_slice %1 {offsets = [0, 1], sizes = [16, 1], strides = [1, 1]} : vector<16x4xf32> to vector<16x1xf32>
    %8 = vector.extract_strided_slice %0 {offsets = [1, 0], sizes = [1, 768], strides = [1, 1]} : vector<4x768xf32> to vector<1x768xf32>
    %9 = vector.broadcast %7 : vector<16x1xf32> to vector<16x768xf32>
    %10 = vector.broadcast %8 : vector<1x768xf32> to vector<16x768xf32>
    %11 = arith.mulf %9, %10 : vector<16x768xf32>
    %12 = arith.addf %6, %11 : vector<16x768xf32>
    %13 = vector.extract_strided_slice %1 {offsets = [0, 2], sizes = [16, 1], strides = [1, 1]} : vector<16x4xf32> to vector<16x1xf32>
    %14 = vector.extract_strided_slice %0 {offsets = [2, 0], sizes = [1, 768], strides = [1, 1]} : vector<4x768xf32> to vector<1x768xf32>
    %15 = vector.broadcast %13 : vector<16x1xf32> to vector<16x768xf32>
    %16 = vector.broadcast %14 : vector<1x768xf32> to vector<16x768xf32>
    %17 = arith.mulf %15, %16 : vector<16x768xf32>
    %18 = arith.addf %12, %17 : vector<16x768xf32>
    %19 = vector.extract_strided_slice %1 {offsets = [0, 3], sizes = [16, 1], strides = [1, 1]} : vector<16x4xf32> to vector<16x1xf32>
    %20 = vector.extract_strided_slice %0 {offsets = [3, 0], sizes = [1, 768], strides = [1, 1]} : vector<4x768xf32> to vector<1x768xf32>
    %21 = vector.broadcast %19 : vector<16x1xf32> to vector<16x768xf32>
    %22 = vector.broadcast %20 : vector<1x768xf32> to vector<16x768xf32>
    %23 = arith.mulf %21, %22 : vector<16x768xf32>
    %24 = arith.addf %18, %23 : vector<16x768xf32>
    %c0_3 = arith.constant 0 : index
    %c0_4 = arith.constant 0 : index
    %25 = vector.load %arg3[%c0_3, %c0_4] : memref<16x1xf32, #tpu.memory_space<vmem>>, vector<16x1xf32>
    %26 = vector.broadcast %25 : vector<16x1xf32> to vector<16x768xf32>
    %27 = arith.addf %24, %26 : vector<16x768xf32>
    %cst = arith.constant 0.000000e+00 : f32
    %28 = vector.broadcast %cst : f32 to vector<16x768xf32>
    %29 = arith.maximumf %27, %28 : vector<16x768xf32>
    %c0_5 = arith.constant 0 : index
    %c0_6 = arith.constant 0 : index
    %30 = vector.load %arg8[%c0_5, %c0_6] : memref<1x768xf32, #tpu.memory_space<vmem>>, vector<1x768xf32>
    %31 = vector.broadcast %30 : vector<1x768xf32> to vector<16x768xf32>
    %32 = arith.mulf %29, %31 : vector<16x768xf32>
    %33 = vector.extract_strided_slice %32 {offsets = [0, 0], sizes = [16, 730], strides = [1, 1]} : vector<16x768xf32> to vector<16x730xf32>
    %c0_7 = arith.constant 0 : index
    %c0_8 = arith.constant 0 : index
    %34 = vector.load %arg4[%c0_7, %c0_8] : memref<16x9xf32, #tpu.memory_space<vmem>>, vector<16x1xf32>
    %35 = vector.broadcast %34 : vector<16x1xf32> to vector<16x730xf32>
    %36 = arith.mulf %33, %35 : vector<16x730xf32>
    %37 = vector.extract_strided_slice %32 {offsets = [0, 1], sizes = [16, 730], strides = [1, 1]} : vector<16x768xf32> to vector<16x730xf32>
    %c0_9 = arith.constant 0 : index
    %c1 = arith.constant 1 : index
    %38 = vector.load %arg4[%c0_9, %c1] : memref<16x9xf32, #tpu.memory_space<vmem>>, vector<16x1xf32>
    %39 = vector.broadcast %38 : vector<16x1xf32> to vector<16x730xf32>
    %40 = arith.mulf %37, %39 : vector<16x730xf32>
    %41 = arith.addf %36, %40 : vector<16x730xf32>
    %42 = vector.extract_strided_slice %32 {offsets = [0, 2], sizes = [16, 730], strides = [1, 1]} : vector<16x768xf32> to vector<16x730xf32>
    %c0_10 = arith.constant 0 : index
    %c2 = arith.constant 2 : index
    %43 = vector.load %arg4[%c0_10, %c2] : memref<16x9xf32, #tpu.memory_space<vmem>>, vector<16x1xf32>
    %44 = vector.broadcast %43 : vector<16x1xf32> to vector<16x730xf32>
    %45 = arith.mulf %42, %44 : vector<16x730xf32>
    %46 = arith.addf %41, %45 : vector<16x730xf32>
    %47 = vector.extract_strided_slice %32 {offsets = [0, 18], sizes = [16, 730], strides = [1, 1]} : vector<16x768xf32> to vector<16x730xf32>
    %c0_11 = arith.constant 0 : index
    %c3 = arith.constant 3 : index
    %48 = vector.load %arg4[%c0_11, %c3] : memref<16x9xf32, #tpu.memory_space<vmem>>, vector<16x1xf32>
    %49 = vector.broadcast %48 : vector<16x1xf32> to vector<16x730xf32>
    %50 = arith.mulf %47, %49 : vector<16x730xf32>
    %51 = arith.addf %46, %50 : vector<16x730xf32>
    %52 = vector.extract_strided_slice %32 {offsets = [0, 19], sizes = [16, 730], strides = [1, 1]} : vector<16x768xf32> to vector<16x730xf32>
    %c0_12 = arith.constant 0 : index
    %c4 = arith.constant 4 : index
    %53 = vector.load %arg4[%c0_12, %c4] : memref<16x9xf32, #tpu.memory_space<vmem>>, vector<16x1xf32>
    %54 = vector.broadcast %53 : vector<16x1xf32> to vector<16x730xf32>
    %55 = arith.mulf %52, %54 : vector<16x730xf32>
    %56 = arith.addf %51, %55 : vector<16x730xf32>
    %57 = vector.extract_strided_slice %32 {offsets = [0, 20], sizes = [16, 730], strides = [1, 1]} : vector<16x768xf32> to vector<16x730xf32>
    %c0_13 = arith.constant 0 : index
    %c5 = arith.constant 5 : index
    %58 = vector.load %arg4[%c0_13, %c5] : memref<16x9xf32, #tpu.memory_space<vmem>>, vector<16x1xf32>
    %59 = vector.broadcast %58 : vector<16x1xf32> to vector<16x730xf32>
    %60 = arith.mulf %57, %59 : vector<16x730xf32>
    %61 = arith.addf %56, %60 : vector<16x730xf32>
    %62 = vector.extract_strided_slice %32 {offsets = [0, 36], sizes = [16, 730], strides = [1, 1]} : vector<16x768xf32> to vector<16x730xf32>
    %c0_14 = arith.constant 0 : index
    %c6 = arith.constant 6 : index
    %63 = vector.load %arg4[%c0_14, %c6] : memref<16x9xf32, #tpu.memory_space<vmem>>, vector<16x1xf32>
    %64 = vector.broadcast %63 : vector<16x1xf32> to vector<16x730xf32>
    %65 = arith.mulf %62, %64 : vector<16x730xf32>
    %66 = arith.addf %61, %65 : vector<16x730xf32>
    %67 = vector.extract_strided_slice %32 {offsets = [0, 37], sizes = [16, 730], strides = [1, 1]} : vector<16x768xf32> to vector<16x730xf32>
    %c0_15 = arith.constant 0 : index
    %c7 = arith.constant 7 : index
    %68 = vector.load %arg4[%c0_15, %c7] : memref<16x9xf32, #tpu.memory_space<vmem>>, vector<16x1xf32>
    %69 = vector.broadcast %68 : vector<16x1xf32> to vector<16x730xf32>
    %70 = arith.mulf %67, %69 : vector<16x730xf32>
    %71 = arith.addf %66, %70 : vector<16x730xf32>
    %72 = vector.extract_strided_slice %32 {offsets = [0, 38], sizes = [16, 730], strides = [1, 1]} : vector<16x768xf32> to vector<16x730xf32>
    %c0_16 = arith.constant 0 : index
    %c8 = arith.constant 8 : index
    %73 = vector.load %arg4[%c0_16, %c8] : memref<16x9xf32, #tpu.memory_space<vmem>>, vector<16x1xf32>
    %74 = vector.broadcast %73 : vector<16x1xf32> to vector<16x730xf32>
    %75 = arith.mulf %72, %74 : vector<16x730xf32>
    %76 = arith.addf %71, %75 : vector<16x730xf32>
    %c0_17 = arith.constant 0 : index
    %c0_18 = arith.constant 0 : index
    %77 = vector.load %arg5[%c0_17, %c0_18] : memref<16x1xf32, #tpu.memory_space<vmem>>, vector<16x1xf32>
    %78 = vector.broadcast %77 : vector<16x1xf32> to vector<16x730xf32>
    %79 = arith.addf %76, %78 : vector<16x730xf32>
    %cst_19 = arith.constant 0.000000e+00 : f32
    %80 = vector.broadcast %cst_19 : f32 to vector<16x730xf32>
    %81 = arith.maximumf %79, %80 : vector<16x730xf32>
    %c0_20 = arith.constant 0 : index
    %c0_21 = arith.constant 0 : index
    %82 = vector.load %arg6[%c0_20, %c0_21] : memref<4x16xf32, #tpu.memory_space<vmem>>, vector<4x16xf32>
    %83 = vector.extract_strided_slice %82 {offsets = [0, 0], sizes = [4, 1], strides = [1, 1]} : vector<4x16xf32> to vector<4x1xf32>
    %84 = vector.extract_strided_slice %81 {offsets = [0, 0], sizes = [1, 730], strides = [1, 1]} : vector<16x730xf32> to vector<1x730xf32>
    %85 = vector.broadcast %83 : vector<4x1xf32> to vector<4x730xf32>
    %86 = vector.broadcast %84 : vector<1x730xf32> to vector<4x730xf32>
    %87 = arith.mulf %85, %86 : vector<4x730xf32>
    %88 = vector.extract_strided_slice %82 {offsets = [0, 1], sizes = [4, 1], strides = [1, 1]} : vector<4x16xf32> to vector<4x1xf32>
    %89 = vector.extract_strided_slice %81 {offsets = [1, 0], sizes = [1, 730], strides = [1, 1]} : vector<16x730xf32> to vector<1x730xf32>
    %90 = vector.broadcast %88 : vector<4x1xf32> to vector<4x730xf32>
    %91 = vector.broadcast %89 : vector<1x730xf32> to vector<4x730xf32>
    %92 = arith.mulf %90, %91 : vector<4x730xf32>
    %93 = arith.addf %87, %92 : vector<4x730xf32>
    %94 = vector.extract_strided_slice %82 {offsets = [0, 2], sizes = [4, 1], strides = [1, 1]} : vector<4x16xf32> to vector<4x1xf32>
    %95 = vector.extract_strided_slice %81 {offsets = [2, 0], sizes = [1, 730], strides = [1, 1]} : vector<16x730xf32> to vector<1x730xf32>
    %96 = vector.broadcast %94 : vector<4x1xf32> to vector<4x730xf32>
    %97 = vector.broadcast %95 : vector<1x730xf32> to vector<4x730xf32>
    %98 = arith.mulf %96, %97 : vector<4x730xf32>
    %99 = arith.addf %93, %98 : vector<4x730xf32>
    %100 = vector.extract_strided_slice %82 {offsets = [0, 3], sizes = [4, 1], strides = [1, 1]} : vector<4x16xf32> to vector<4x1xf32>
    %101 = vector.extract_strided_slice %81 {offsets = [3, 0], sizes = [1, 730], strides = [1, 1]} : vector<16x730xf32> to vector<1x730xf32>
    %102 = vector.broadcast %100 : vector<4x1xf32> to vector<4x730xf32>
    %103 = vector.broadcast %101 : vector<1x730xf32> to vector<4x730xf32>
    %104 = arith.mulf %102, %103 : vector<4x730xf32>
    %105 = arith.addf %99, %104 : vector<4x730xf32>
    %106 = vector.extract_strided_slice %82 {offsets = [0, 4], sizes = [4, 1], strides = [1, 1]} : vector<4x16xf32> to vector<4x1xf32>
    %107 = vector.extract_strided_slice %81 {offsets = [4, 0], sizes = [1, 730], strides = [1, 1]} : vector<16x730xf32> to vector<1x730xf32>
    %108 = vector.broadcast %106 : vector<4x1xf32> to vector<4x730xf32>
    %109 = vector.broadcast %107 : vector<1x730xf32> to vector<4x730xf32>
    %110 = arith.mulf %108, %109 : vector<4x730xf32>
    %111 = arith.addf %105, %110 : vector<4x730xf32>
    %112 = vector.extract_strided_slice %82 {offsets = [0, 5], sizes = [4, 1], strides = [1, 1]} : vector<4x16xf32> to vector<4x1xf32>
    %113 = vector.extract_strided_slice %81 {offsets = [5, 0], sizes = [1, 730], strides = [1, 1]} : vector<16x730xf32> to vector<1x730xf32>
    %114 = vector.broadcast %112 : vector<4x1xf32> to vector<4x730xf32>
    %115 = vector.broadcast %113 : vector<1x730xf32> to vector<4x730xf32>
    %116 = arith.mulf %114, %115 : vector<4x730xf32>
    %117 = arith.addf %111, %116 : vector<4x730xf32>
    %118 = vector.extract_strided_slice %82 {offsets = [0, 6], sizes = [4, 1], strides = [1, 1]} : vector<4x16xf32> to vector<4x1xf32>
    %119 = vector.extract_strided_slice %81 {offsets = [6, 0], sizes = [1, 730], strides = [1, 1]} : vector<16x730xf32> to vector<1x730xf32>
    %120 = vector.broadcast %118 : vector<4x1xf32> to vector<4x730xf32>
    %121 = vector.broadcast %119 : vector<1x730xf32> to vector<4x730xf32>
    %122 = arith.mulf %120, %121 : vector<4x730xf32>
    %123 = arith.addf %117, %122 : vector<4x730xf32>
    %124 = vector.extract_strided_slice %82 {offsets = [0, 7], sizes = [4, 1], strides = [1, 1]} : vector<4x16xf32> to vector<4x1xf32>
    %125 = vector.extract_strided_slice %81 {offsets = [7, 0], sizes = [1, 730], strides = [1, 1]} : vector<16x730xf32> to vector<1x730xf32>
    %126 = vector.broadcast %124 : vector<4x1xf32> to vector<4x730xf32>
    %127 = vector.broadcast %125 : vector<1x730xf32> to vector<4x730xf32>
    %128 = arith.mulf %126, %127 : vector<4x730xf32>
    %129 = arith.addf %123, %128 : vector<4x730xf32>
    %130 = vector.extract_strided_slice %82 {offsets = [0, 8], sizes = [4, 1], strides = [1, 1]} : vector<4x16xf32> to vector<4x1xf32>
    %131 = vector.extract_strided_slice %81 {offsets = [8, 0], sizes = [1, 730], strides = [1, 1]} : vector<16x730xf32> to vector<1x730xf32>
    %132 = vector.broadcast %130 : vector<4x1xf32> to vector<4x730xf32>
    %133 = vector.broadcast %131 : vector<1x730xf32> to vector<4x730xf32>
    %134 = arith.mulf %132, %133 : vector<4x730xf32>
    %135 = arith.addf %129, %134 : vector<4x730xf32>
    %136 = vector.extract_strided_slice %82 {offsets = [0, 9], sizes = [4, 1], strides = [1, 1]} : vector<4x16xf32> to vector<4x1xf32>
    %137 = vector.extract_strided_slice %81 {offsets = [9, 0], sizes = [1, 730], strides = [1, 1]} : vector<16x730xf32> to vector<1x730xf32>
    %138 = vector.broadcast %136 : vector<4x1xf32> to vector<4x730xf32>
    %139 = vector.broadcast %137 : vector<1x730xf32> to vector<4x730xf32>
    %140 = arith.mulf %138, %139 : vector<4x730xf32>
    %141 = arith.addf %135, %140 : vector<4x730xf32>
    %142 = vector.extract_strided_slice %82 {offsets = [0, 10], sizes = [4, 1], strides = [1, 1]} : vector<4x16xf32> to vector<4x1xf32>
    %143 = vector.extract_strided_slice %81 {offsets = [10, 0], sizes = [1, 730], strides = [1, 1]} : vector<16x730xf32> to vector<1x730xf32>
    %144 = vector.broadcast %142 : vector<4x1xf32> to vector<4x730xf32>
    %145 = vector.broadcast %143 : vector<1x730xf32> to vector<4x730xf32>
    %146 = arith.mulf %144, %145 : vector<4x730xf32>
    %147 = arith.addf %141, %146 : vector<4x730xf32>
    %148 = vector.extract_strided_slice %82 {offsets = [0, 11], sizes = [4, 1], strides = [1, 1]} : vector<4x16xf32> to vector<4x1xf32>
    %149 = vector.extract_strided_slice %81 {offsets = [11, 0], sizes = [1, 730], strides = [1, 1]} : vector<16x730xf32> to vector<1x730xf32>
    %150 = vector.broadcast %148 : vector<4x1xf32> to vector<4x730xf32>
    %151 = vector.broadcast %149 : vector<1x730xf32> to vector<4x730xf32>
    %152 = arith.mulf %150, %151 : vector<4x730xf32>
    %153 = arith.addf %147, %152 : vector<4x730xf32>
    %154 = vector.extract_strided_slice %82 {offsets = [0, 12], sizes = [4, 1], strides = [1, 1]} : vector<4x16xf32> to vector<4x1xf32>
    %155 = vector.extract_strided_slice %81 {offsets = [12, 0], sizes = [1, 730], strides = [1, 1]} : vector<16x730xf32> to vector<1x730xf32>
    %156 = vector.broadcast %154 : vector<4x1xf32> to vector<4x730xf32>
    %157 = vector.broadcast %155 : vector<1x730xf32> to vector<4x730xf32>
    %158 = arith.mulf %156, %157 : vector<4x730xf32>
    %159 = arith.addf %153, %158 : vector<4x730xf32>
    %160 = vector.extract_strided_slice %82 {offsets = [0, 13], sizes = [4, 1], strides = [1, 1]} : vector<4x16xf32> to vector<4x1xf32>
    %161 = vector.extract_strided_slice %81 {offsets = [13, 0], sizes = [1, 730], strides = [1, 1]} : vector<16x730xf32> to vector<1x730xf32>
    %162 = vector.broadcast %160 : vector<4x1xf32> to vector<4x730xf32>
    %163 = vector.broadcast %161 : vector<1x730xf32> to vector<4x730xf32>
    %164 = arith.mulf %162, %163 : vector<4x730xf32>
    %165 = arith.addf %159, %164 : vector<4x730xf32>
    %166 = vector.extract_strided_slice %82 {offsets = [0, 14], sizes = [4, 1], strides = [1, 1]} : vector<4x16xf32> to vector<4x1xf32>
    %167 = vector.extract_strided_slice %81 {offsets = [14, 0], sizes = [1, 730], strides = [1, 1]} : vector<16x730xf32> to vector<1x730xf32>
    %168 = vector.broadcast %166 : vector<4x1xf32> to vector<4x730xf32>
    %169 = vector.broadcast %167 : vector<1x730xf32> to vector<4x730xf32>
    %170 = arith.mulf %168, %169 : vector<4x730xf32>
    %171 = arith.addf %165, %170 : vector<4x730xf32>
    %172 = vector.extract_strided_slice %82 {offsets = [0, 15], sizes = [4, 1], strides = [1, 1]} : vector<4x16xf32> to vector<4x1xf32>
    %173 = vector.extract_strided_slice %81 {offsets = [15, 0], sizes = [1, 730], strides = [1, 1]} : vector<16x730xf32> to vector<1x730xf32>
    %174 = vector.broadcast %172 : vector<4x1xf32> to vector<4x730xf32>
    %175 = vector.broadcast %173 : vector<1x730xf32> to vector<4x730xf32>
    %176 = arith.mulf %174, %175 : vector<4x730xf32>
    %177 = arith.addf %171, %176 : vector<4x730xf32>
    %c0_22 = arith.constant 0 : index
    %c0_23 = arith.constant 0 : index
    %178 = vector.load %arg7[%c0_22, %c0_23] : memref<4x1xf32, #tpu.memory_space<vmem>>, vector<4x1xf32>
    %179 = vector.broadcast %178 : vector<4x1xf32> to vector<4x730xf32>
    %180 = arith.addf %177, %179 : vector<4x730xf32>
    %181 = vector.extract_strided_slice %0 {offsets = [0, 19], sizes = [4, 730], strides = [1, 1]} : vector<4x768xf32> to vector<4x730xf32>
    %182 = arith.addf %180, %181 : vector<4x730xf32>
    %c0_24 = arith.constant 0 : index
    %c0_25 = arith.constant 0 : index
    %183 = vector.load %arg9[%c0_24, %c0_25] : memref<4x768xf32, #tpu.memory_space<vmem>>, vector<4x730xf32>
    tpu.vector_store %arg9[%c0_24, %c0_25], %182 {strides = array<i32>} : memref<4x768xf32, #tpu.memory_space<vmem>>, vector<4x730xf32>,
    return
  }
  func.func @transform_0(%arg0: i32) -> (i32, i32) {
    %c0_i32 = arith.constant 0 : i32
    %c0_i32_0 = arith.constant 0 : i32
    return %c0_i32, %arg0 : i32, i32
  }
  func.func @transform_1(%arg0: i32) -> (i32, i32) {
    %c0_i32 = arith.constant 0 : i32
    %c0_i32_0 = arith.constant 0 : i32
    %c0_i32_1 = arith.constant 0 : i32
    return %c0_i32, %c0_i32_0 : i32, i32
  }
  func.func @transform_2(%arg0: i32) -> (i32, i32) {
    %c0_i32 = arith.constant 0 : i32
    %c0_i32_0 = arith.constant 0 : i32
    %c0_i32_1 = arith.constant 0 : i32
    return %c0_i32, %c0_i32_0 : i32, i32
  }
  func.func @transform_3(%arg0: i32) -> (i32, i32) {
    %c0_i32 = arith.constant 0 : i32
    %c0_i32_0 = arith.constant 0 : i32
    %c0_i32_1 = arith.constant 0 : i32
    return %c0_i32, %c0_i32_0 : i32, i32
  }
  func.func @transform_4(%arg0: i32) -> (i32, i32) {
    %c0_i32 = arith.constant 0 : i32
    %c0_i32_0 = arith.constant 0 : i32
    %c0_i32_1 = arith.constant 0 : i32
    return %c0_i32, %c0_i32_0 : i32, i32
  }
  func.func @transform_5(%arg0: i32) -> (i32, i32) {
    %c0_i32 = arith.constant 0 : i32
    %c0_i32_0 = arith.constant 0 : i32
    %c0_i32_1 = arith.constant 0 : i32
    return %c0_i32, %c0_i32_0 : i32, i32
  }
  func.func @transform_6(%arg0: i32) -> (i32, i32) {
    %c0_i32 = arith.constant 0 : i32
    %c0_i32_0 = arith.constant 0 : i32
    %c0_i32_1 = arith.constant 0 : i32
    return %c0_i32, %c0_i32_0 : i32, i32
  }
  func.func @transform_7(%arg0: i32) -> (i32, i32) {
    %c0_i32 = arith.constant 0 : i32
    %c0_i32_0 = arith.constant 0 : i32
    %c0_i32_1 = arith.constant 0 : i32
    return %c0_i32, %c0_i32_0 : i32, i32
  }
  func.func @transform_8(%arg0: i32) -> (i32, i32) {
    %c0_i32 = arith.constant 0 : i32
    %c0_i32_0 = arith.constant 0 : i32
    return %c0_i32, %arg0 : i32, i32
  }
}

</mosaic_0001>

<bundles_post_ra>
// kernel: mbblock_forward.1
= control target key start
LH: loop header
LB: loop body
LE: loop exit
PB: predicated region body
PF: predicated region fallthrough
CT: control target
= control target key end

     0   :  { %13 = vsyncpa [#allocation3], 0  ;;  %s3717_s0 = inlined_call_operand.hbm [shape: f32[4,768], index: 0, kind: input, shape index: {}]   ;;  %s3718_s1 = inlined_call_operand.hbm [shape: f32[16,4], index: 1, kind: input, shape index: {}]   ;;  %s3719_s2 = inlined_call_operand.hbm [shape: f32[16,1], index: 2, kind: input, shape index: {}]   ;;  %s3720_s3 = inlined_call_operand.hbm [shape: f32[16,9], index: 3, kind: input, shape index: {}]   ;;  %s3721_s4 = inlined_call_operand.hbm [shape: f32[16,1], index: 4, kind: input, shape index: {}]   ;;  %s3722_s5 = inlined_call_operand.hbm [shape: f32[4,16], index: 5, kind: input, shape index: {}]   ;;  %s3723_s6 = inlined_call_operand.hbm [shape: f32[4,1], index: 6, kind: input, shape index: {}]   ;;  %s3724_s7 = inlined_call_operand.hbm [shape: f32[1,768], index: 7, kind: input, shape index: {}]   ;;  %s3725_s8 = inlined_call_operand.hbm [shape: f32[4,768], index: 8, kind: output, shape index: {}]  }
   0x1   :  { %14 = vsyncpa [#allocation6], 0 }
   0x2   :  { %15 = vsyncpa [#allocation9], 0 }
   0x3   :  { %16 = vsyncpa [#allocation12], 0 }
   0x4   :  { %17 = vsyncpa [#allocation15], 0 }
   0x5   :  { %18 = vsyncpa [#allocation4], 0  ;;  %s2348_s27 = smov [#allocation5]   ;;  %s2138_s9 = scalar_lea.hbm %s3718_s1, 256 }
   0x6   :  { %s34_s28 = sshll.u32 %s2348_s27, 4  ;;  %p2139_p0 = scmp.ne.s32.totalorder %s3718_s1, %s2138_s9  ;;  %s35_s28 = int_to_ptr.vmem [resolvable:$true] %s34_s28 }
   0x7   :  { %p2142_p1 = scmp.lt.u32.totalorder %s2138_s9, %s3718_s1 }
   0x9   :  { %p2144_p2 = pnand %p2142_p1, %p2139_p0 }
   0xb   :  { %2147 = shalt.err (!%p2144_p2)
}
   0xc   :  { %s2148_s14 = scalar_lea.vmem %s35_s28, 256  ;;  %p2153_p4 = scmp.lt.s32.totalorder %s35_s28, %s35_s28 }
   0xd   :  { %p2149_p3 = scmp.ne.s32.totalorder %s35_s28, %s2148_s14  ;;  %p2154_p5 = scmp.lt.s32.totalorder %s2148_s14, %s2148_s14 }
   0xf   :  { %p2155_p6 = por %p2154_p5, %p2153_p4 }
  0x11   :  { %p2156_p7 = pnand %p2155_p6, %p2149_p3 }
  0x13   :  { %2159 = shalt.err (!%p2156_p7)
}
  0x14   :  { %s2349_s15 = smov 128   ;;  %s2350_s16 = smov 8  }
  0x15   :  { %40 = dma.hbm_to_vmem [thread:$0]  %s3718_s1, 256, %s35_s28, [#allocation6], %s2349_s15, %s2349_s15, %s2350_s16  }
  0x16   :  { %s2351_s19 = smov [#allocation8]   ;;  %s2352_s21 = smov [#allocation11]  }
  0x17   :  { %s58_s20 = sshll.u32 %s2351_s19, 4  ;;  %s83_s22 = sshll.u32 %s2352_s21, 4  ;;  %s59_s20 = int_to_ptr.vmem [resolvable:$true] %s58_s20  ;;  %s84_s22 = int_to_ptr.vmem [resolvable:$true] %s83_s22 }
  0x18   :  { %s2160_s25 = scalar_lea.hbm %s3720_s3, 256 }
  0x19   :  { %p2161_p8 = scmp.ne.s32.totalorder %s3720_s3, %s2160_s25  ;;  %p2164_p9 = scmp.lt.u32.totalorder %s2160_s25, %s3720_s3 }
  0x1b   :  { %p2166_p10 = pnand %p2164_p9, %p2161_p8 }
  0x1d   :  { %2169 = shalt.err (!%p2166_p10)
}
  0x1e   :  { %s2170_s1 = scalar_lea.vmem %s59_s20, 256  ;;  %p2175_p12 = scmp.lt.s32.totalorder %s59_s20, %s59_s20 }
  0x1f   :  { %p2171_p11 = scmp.ne.s32.totalorder %s59_s20, %s2170_s1  ;;  %p2176_p13 = scmp.lt.s32.totalorder %s2170_s1, %s2170_s1 }
  0x21   :  { %p2177_p0 = por %p2176_p13, %p2175_p12 }
  0x23   :  { %p2178_p1 = pnand %p2177_p0, %p2171_p11 }
  0x25   :  { %2181 = shalt.err (!%p2178_p1)
}
  0x26   :  { %64 = dma.hbm_to_vmem [thread:$0]  %s3720_s3, 256, %s59_s20, [#allocation9], %s2349_s15, %s2349_s15, %s2350_s16  }
  0x27   :  { %s2182_s12 = scalar_lea.hbm %s3722_s5, 64 }
  0x28   :  { %p2183_p2 = scmp.ne.s32.totalorder %s3722_s5, %s2182_s12  ;;  %p2186_p3 = scmp.lt.u32.totalorder %s2182_s12, %s3722_s5 }
  0x2a   :  { %p2188_p4 = pnand %p2186_p3, %p2183_p2 }
  0x2c   :  { %2191 = shalt.err (!%p2188_p4)
}
  0x2d   :  { %s2192_s19 = scalar_lea.vmem %s84_s22, 64  ;;  %p2197_p6 = scmp.lt.s32.totalorder %s84_s22, %s84_s22 }
  0x2e   :  { %p2193_p5 = scmp.ne.s32.totalorder %s84_s22, %s2192_s19  ;;  %p2198_p7 = scmp.lt.s32.totalorder %s2192_s19, %s2192_s19 }
  0x30   :  { %p2199_p8 = por %p2198_p7, %p2197_p6 }
  0x32   :  { %p2200_p9 = pnand %p2199_p8, %p2193_p5 }
  0x34   :  { %2203 = shalt.err (!%p2200_p9)
}
  0x35   :  { %86 = dma.hbm_to_vmem [thread:$0]  %s3722_s5, 64, %s84_s22, [#allocation12]  }
  0x36   :  { %s2353_s21 = smov [#allocation2]   ;;  %s2354_s24 = smov [#allocation7]  }
  0x37   :  { %s25_s23 = sshll.u32 %s2353_s21, 4  ;;  %s46_s25 = sshll.u32 %s2354_s24, 4  ;;  %s26_s23 = int_to_ptr.vmem [resolvable:$true] %s25_s23  ;;  %s47_s25 = int_to_ptr.vmem [resolvable:$true] %s46_s25 }
  0x38   :  { %s2204_s29 = scalar_lea.hbm %s3717_s0, 384 }
  0x39   :  { %p2205_p10 = scmp.ne.s32.totalorder %s3717_s0, %s2204_s29  ;;  %p2208_p11 = scmp.lt.u32.totalorder %s2204_s29, %s3717_s0 }
  0x3b   :  { %p2210_p12 = pnand %p2208_p11, %p2205_p10 }
  0x3d   :  { %2213 = shalt.err (!%p2210_p12)
}
  0x3e   :  { %s2214_s5 = scalar_lea.vmem %s26_s23, 384  ;;  %p2219_p0 = scmp.lt.s32.totalorder %s26_s23, %s26_s23 }
  0x3f   :  { %p2215_p13 = scmp.ne.s32.totalorder %s26_s23, %s2214_s5  ;;  %p2220_p1 = scmp.lt.s32.totalorder %s2214_s5, %s2214_s5 }
  0x41   :  { %p2221_p2 = por %p2220_p1, %p2219_p0 }
  0x43   :  { %p2222_p3 = pnand %p2221_p2, %p2215_p13 }
  0x45   :  { %2225 = shalt.err (!%p2222_p3)
}
  0x46   :  { %28 = dma.hbm_to_vmem [thread:$0]  %s3717_s0, 384, %s26_s23, [#allocation3]  }
  0x47   :  { %s2226_s13 = scalar_lea.hbm %s3719_s2, 256 }
  0x48   :  { %p2227_p4 = scmp.ne.s32.totalorder %s3719_s2, %s2226_s13  ;;  %p2230_p5 = scmp.lt.u32.totalorder %s2226_s13, %s3719_s2 }
  0x4a   :  { %p2232_p6 = pnand %p2230_p5, %p2227_p4 }
  0x4c   :  { %2235 = shalt.err (!%p2232_p6)
}
  0x4d   :  { %s2236_s3 = scalar_lea.vmem %s47_s25, 256  ;;  %p2241_p8 = scmp.lt.s32.totalorder %s47_s25, %s47_s25 }
  0x4e   :  { %p2237_p7 = scmp.ne.s32.totalorder %s47_s25, %s2236_s3  ;;  %p2242_p9 = scmp.lt.s32.totalorder %s2236_s3, %s2236_s3 }
  0x50   :  { %p2243_p10 = por %p2242_p9, %p2241_p8 }
  0x52   :  { %p2244_p11 = pnand %p2243_p10, %p2237_p7 }
  0x54   :  { %2247 = shalt.err (!%p2244_p11)
}
  0x55   :  { %52 = dma.hbm_to_vmem [thread:$0]  %s3719_s2, 256, %s47_s25, [#allocation6], %s2349_s15, %s2349_s15, %s2350_s16  }
  0x56   :  { %s2355_s21 = smov [#allocation10]   ;;  %s2356_s24 = smov [#allocation13]  }
  0x57   :  { %s70_s23 = sshll.u32 %s2355_s21, 4  ;;  %s93_s26 = sshll.u32 %s2356_s24, 4  ;;  %s71_s23 = int_to_ptr.vmem [resolvable:$true] %s70_s23  ;;  %s94_s26 = int_to_ptr.vmem [resolvable:$true] %s93_s26 }
  0x58   :  { %s2248_s30 = scalar_lea.hbm %s3721_s4, 256 }
  0x59   :  { %p2249_p12 = scmp.ne.s32.totalorder %s3721_s4, %s2248_s30  ;;  %p2252_p13 = scmp.lt.u32.totalorder %s2248_s30, %s3721_s4 }
  0x5b   :  { %p2254_p0 = pnand %p2252_p13, %p2249_p12 }
  0x5d   :  { %2257 = shalt.err (!%p2254_p0)
}
  0x5e   :  { %s2258_s2 = scalar_lea.vmem %s71_s23, 256  ;;  %p2263_p2 = scmp.lt.s32.totalorder %s71_s23, %s71_s23 }
  0x5f   :  { %p2259_p1 = scmp.ne.s32.totalorder %s71_s23, %s2258_s2  ;;  %p2264_p3 = scmp.lt.s32.totalorder %s2258_s2, %s2258_s2 }
  0x61   :  { %p2265_p4 = por %p2264_p3, %p2263_p2 }
  0x63   :  { %p2266_p5 = pnand %p2265_p4, %p2259_p1 }
  0x65   :  { %2269 = shalt.err (!%p2266_p5)
}
  0x66   :  { %76 = dma.hbm_to_vmem [thread:$0]  %s3721_s4, 256, %s71_s23, [#allocation9], %s2349_s15, %s2349_s15, %s2350_s16  }
  0x67   :  { %s2270_s12 = scalar_lea.hbm %s3723_s6, 64 }
  0x68   :  { %p2271_p6 = scmp.ne.s32.totalorder %s3723_s6, %s2270_s12  ;;  %p2274_p7 = scmp.lt.u32.totalorder %s2270_s12, %s3723_s6 }
  0x6a   :  { %p2276_p8 = pnand %p2274_p7, %p2271_p6 }
  0x6c   :  { %2279 = shalt.err (!%p2276_p8)
}
  0x6d   :  { %s2280_s19 = scalar_lea.vmem %s94_s26, 64  ;;  %p2285_p10 = scmp.lt.s32.totalorder %s94_s26, %s94_s26 }
  0x6e   :  { %p2281_p9 = scmp.ne.s32.totalorder %s94_s26, %s2280_s19  ;;  %p2286_p11 = scmp.lt.s32.totalorder %s2280_s19, %s2280_s19 }
  0x70   :  { %p2287_p12 = por %p2286_p11, %p2285_p10 }
  0x72   :  { %p2288_p13 = pnand %p2287_p12, %p2281_p9 }
  0x74   :  { %2291 = shalt.err (!%p2288_p13)
}
  0x75   :  { %96 = dma.hbm_to_vmem [thread:$0]  %s3723_s6, 64, %s94_s26, [#allocation12]  }
  0x76   :  { %s2357_s16 = smov [#allocation14]   ;;  %s2292_s21 = scalar_lea.hbm %s3724_s7, 96 }
  0x77   :  { %s103_s3 = sshll.u32 %s2357_s16, 4  ;;  %p2293_p0 = scmp.ne.s32.totalorder %s3724_s7, %s2292_s21  ;;  %s104_s3 = int_to_ptr.vmem [resolvable:$true] %s103_s3 }
  0x78   :  { %p2296_p1 = scmp.lt.u32.totalorder %s2292_s21, %s3724_s7 }
  0x7a   :  { %p2298_p2 = pnand %p2296_p1, %p2293_p0 }
  0x7c   :  { %2301 = shalt.err (!%p2298_p2)
}
  0x7d   :  { %s2302_s30 = scalar_lea.vmem %s104_s3, 96  ;;  %p2307_p4 = scmp.lt.s32.totalorder %s104_s3, %s104_s3 }
  0x7e   :  { %p2303_p3 = scmp.ne.s32.totalorder %s104_s3, %s2302_s30  ;;  %p2308_p5 = scmp.lt.s32.totalorder %s2302_s30, %s2302_s30 }
  0x80   :  { %p2309_p6 = por %p2308_p5, %p2307_p4 }
  0x82   :  { %p2310_p7 = pnand %p2309_p6, %p2303_p3 }
  0x84   :  { %2313 = shalt.err (!%p2310_p7)
}
  0x85   :  { %106 = dma.hbm_to_vmem [thread:$0]  %s3724_s7, 96, %s104_s3, [#allocation15]  }
  0x86   :  { %2336 = dma.done.wait [#allocation3], 384  }
  0x87   :  { %2337 = vsyncadd [#allocation3], 4294966912 }
  0x88   :  { %2338 = dma.done.wait [#allocation6], 512  }
  0x89   :  { %2339 = vsyncadd [#allocation6], 4294966784 }
  0x8a   :  { %2340 = dma.done.wait [#allocation9], 512  }
  0x8b   :  { %2341 = vsyncadd [#allocation9], 4294966784 }
  0x8c   :  { %2342 = dma.done.wait [#allocation12], 128  }
  0x8d   :  { %2343 = vsyncadd [#allocation12], 4294967168 }
  0x8e   :  { %2344 = dma.done.wait [#allocation15], 96  }
  0x8f   :  { %2345 = vsyncadd [#allocation15], 4294967200  ;;  %v3732_v0 = vmov 1   ;;  %v3730_v1 = vmov 0   ;;  %v134_v2 = vld [vmem:[#allocation5] sm:$0xff]  ;;  %v135_v3 = vld [vmem:[#allocation5 + $0x8] sm:$0xff]  ;;  %v149_v12 = vlaneseq }
  0x90   :  { %2094 = vset.pattern.permute.xlu1 %v3732_v0  ;;  %2093 = vset.pattern.permute.xlu0 %v3730_v1  ;;  %v553_v4 = vld [vmem:[#allocation8] sm:$0xff]  ;;  %v3729_v5 = vmov 2   ;;  %v2539_v6 = vld [vmem:[#allocation8 + $0x8] sm:$0xff]  ;;  %v3727_v7 = vmov 3   ;;  %v473_v8 = vld [vmem:[#allocation7] sm:$0xff]  ;;  %v3728_v10 = vmov 4  }
  0x91   :  { %216 = vperm.xlu1 %2094, %v134_v2   ;;  %138 = vperm.xlu0 %2093, %v134_v2   ;;  %3748 = vst [vmem:[#allocation23_spill] sm:$0xff] %v2539_v6  ;;  %v474_v9 = vld [vmem:[#allocation7 + $0x8] sm:$0xff]  ;;  %v3726_v11 = vmov 5   ;;  %v150_v13 = vshrl.u32 %v149_v12, 7  ;;  %v2562_v16 = vld [vmem:[#allocation2] sm:$0xff]  ;;  %v2564_v17 = vld [vmem:[#allocation2 + $0x8] sm:$0xff] }
  0x92   :  { %v2568_v19 = vld [vmem:[#allocation2 + $0x10] sm:$0xff]  ;;  %s2364_s7 = smov 127   ;;  %s2365_s1 = smov 126   ;;  %vm633_vm0 = vcmask 1039360   ;;  %vm724_vm1 = vcmask 1031168   ;;  %vm815_vm2 = vcmask 900096  }
  0x93   :  { %v2558_v14 = vsub.s32 1, %v150_v13  ;;  %v2560_v15 = vsub.s32 5, %v150_v13  ;;  %v2566_v18 = vsub.s32 0, %v150_v13  ;;  %v2576_v23 = vsub.s32 4, %v150_v13  ;;  %s2366_s28 = smov 110   ;;  %s2367_s9 = smov 109  }
  0x94   :  { %v2580_v25 = vsub.s32 2, %v150_v13  ;;  %v2582_v26 = vsub.s32 6, %v150_v13  ;;  %v2608_v39 = vsub.s32 3, %v150_v13  ;;  %v2631_v53 = vsub.s32 7, %v150_v13  ;;  %s2368_s5 = smov 108   ;;  %s2372_s2 = smov 92  }
  0x95   :  { %220 = vperm.xlu1 %2094, %v135_v3   ;;  %143 = vperm.xlu0 %2093, %v135_v3   ;;  %3749 = vst [vmem:[#allocation24_spill] sm:$0xff] %v2558_v14  ;;  %3750 = vst [vmem:[#allocation25_spill] sm:$0xff] %v2566_v18  ;;  %v226_v20 = vrot.slane %v2562_v16, %v2558_v14  ;;  %v230_v21 = vrot.slane %v2562_v16, %v2560_v15  ;;  %vm906_vm3 = vcmask 891904   ;;  %vm997_vm4 = vcmask 883712   ;;  %s2373_s25 = smov 91   ;;  %s2374_s22 = smov 90  }
  0x96   :  { %v234_v22 = vrot.slane %v2564_v17, %v2558_v14  ;;  %3751 = vst [vmem:[#allocation26_spill] sm:$0xff] %v2576_v23  ;;  %v238_v24 = vrot.slane %v2564_v17, %v2560_v15  ;;  %3752 = vst [vmem:[#allocation27_spill] sm:$0xff] %v2580_v25  ;;  %v242_v27 = vrot.slane %v2568_v19, %v2558_v14  ;;  %vm1088_vm5 = vcmask 752640   ;;  %s2382_s10 = smov [#allocation16]  }
  0x97   :  { %3753 = vst [vmem:[#allocation28_spill] sm:$0xff] %v2582_v26  ;;  %v246_v28 = vrot.slane %v2568_v19, %v2560_v15  ;;  %v152_v29 = vrot.slane %v2562_v16, %v2566_v18  ;;  %v2591_v31 = vrot.slane %v226_v20, %v2558_v14  ;;  %v2594_v32 = vrot.slane %v230_v21, %v2558_v14  ;;  %s2045_s11 = sshll.u32 %s2382_s10, 4  ;;  %s2046_s11 = int_to_ptr.vmem [resolvable:$true] %s2045_s11 }
  0x98   :  { %v2597_v33 = vrot.slane %v234_v22, %v2558_v14  ;;  %v156_v35 = vrot.slane %v2562_v16, %v2576_v23  ;;  %v2602_v36 = vrot.slane %v238_v24, %v2558_v14  ;;  %v160_v37 = vrot.slane %v2564_v17, %v2566_v18  ;;  %3754 = vst [vmem:[#allocation29_spill] sm:$0xff] %v2631_v53  ;;  %s2314_s12 = scalar_lea.vmem %s2046_s11, 384  ;;  %p2319_p9 = scmp.lt.s32.totalorder %s2046_s11, %s2046_s11 }
  0x99   :  { %2095 = vset.pattern.permute.xlu1 %v3729_v5  ;;  %557 = vperm.xlu0 %2093, %v553_v4   ;;  %v164_v38 = vrot.slane %v2564_v17, %v2576_v23  ;;  %v168_v40 = vrot.slane %v2568_v19, %v2566_v18  ;;  %v172_v41 = vrot.slane %v2568_v19, %v2576_v23  ;;  %vm1179_vm6 = vcmask 744448   ;;  %p2315_p8 = scmp.ne.s32.totalorder %s2046_s11, %s2314_s12  ;;  %p2320_p10 = scmp.lt.s32.totalorder %s2314_s12, %s2314_s12 }
  0x9a   :  { %306 = vperm.xlu1 %2095, %v135_v3   ;;  %v312_v42 = vrot.slane %v2562_v16, %v2580_v25  ;;  %v316_v43 = vrot.slane %v2562_v16, %v2582_v26  ;;  %v320_v44 = vrot.slane %v2564_v17, %v2580_v25  ;;  %v324_v45 = vrot.slane %v2564_v17, %v2582_v26 }
  0x9b   :  { %v328_v46 = vrot.slane %v2568_v19, %v2580_v25  ;;  %v332_v47 = vrot.slane %v2568_v19, %v2582_v26  ;;  %v272_v48 = vrot.slane %v242_v27, %v2558_v14  ;;  %v276_v49 = vrot.slane %v246_v28, %v2558_v14  ;;  %p2321_p11 = por %p2320_p10, %p2319_p9 }
  0x9c   :  { %v182_v50 = vrot.slane %v152_v29, %v2566_v18  ;;  %v186_v54 = vrot.slane %v156_v35, %v2566_v18  ;;  %v190_v55 = vrot.slane %v160_v37, %v2566_v18  ;;  %v194_v56 = vrot.slane %v164_v38, %v2566_v18  ;;  %v2679_v35 = vld [vmem:[#allocation14] sm:$0x3f] }
  0x9d   :  { %2099 = vset.pattern.permute.xlu0 %v3732_v0  ;;  %v398_v57 = vrot.slane %v2562_v16, %v2608_v39  ;;  %v198_v58 = vrot.slane %v168_v40, %v2566_v18  ;;  %v202_v59 = vrot.slane %v172_v41, %v2566_v18  ;;  %v2641_v60 = vrot.slane %v312_v42, %v2580_v25  ;;  %p2322_p12 = pnand %p2321_p11, %p2315_p8 }
  0x9e   :  { %2096 = vset.pattern.permute.xlu1 %v3727_v7  ;;  %582 = vperm.xlu0 %2099, %v2539_v6   ;;  %v2644_v61 = vrot.slane %v316_v43, %v2580_v25  ;;  %v2647_v62 = vrot.slane %v320_v44, %v2580_v25  ;;  %v2650_v63 = vrot.slane %v324_v45, %v2580_v25  ;;  %vm1270_vm7 = vcmask 736256  }
  0x9f   :  { %388 = vperm.xlu1 %2096, %v134_v2   ;;  %v414_v12 = vrot.slane %v2568_v19, %v2608_v39  ;;  %v2675_v24 = vrot.slane %v398_v57, %v2608_v39  ;;  %vm2035_vm8 = vcmask 1043456   ;;  %vm2036_vm9 = vcmask 736260  }
  0xa0   :  { %vm2037_vm10 = vmor %vm2036_vm9, %vm2035_vm8 }
  0xa2   :  { %2100 = vset.pattern.permute.xlu0 %v3729_v5 }
  0xa3   :  { %2097 = vset.pattern.permute.xlu1 %v3730_v1  ;;  %302 = vperm.xlu0 %2100, %v134_v2   ;;  %v2653_v2 = vrot.slane %v328_v46, %v2580_v25  ;;  %v2691_v46 = vrot.slane %v414_v12, %v2608_v39  ;;  %v2712_v12 = vrot.slane %v2679_v35, %v2576_v23 }
  0xa4   :  { %477 = vperm.xlu1 %2097, %v473_v8   ;;  %v406_v8 = vrot.slane %v2564_v17, %v2608_v39 }
  0xa7   :  { %669 = vperm.xlu0 %2100, %v553_v4  }
  0xa8   :  { %482 = vperm.xlu1 %2097, %v474_v9   ;;  %v410_v9 = vrot.slane %v2564_v17, %v2631_v53 }
  0xaa   :  { %v2688_v45 = vrot.slane %v410_v9, %v2608_v39  ;;  %v2708_v9 = vrot.slane %v2679_v35, %v2580_v25 }
  0xab   :  { %2101 = vset.pattern.permute.xlu0 %v3727_v7 }
  0xac   :  { %562 = vperm.xlu1 %2097, %v2539_v6   ;;  %392 = vperm.xlu0 %2101, %v135_v3   ;;  %v2656_v3 = vrot.slane %v332_v47, %v2580_v25 }
  0xb0   :  { %2098 = vset.pattern.permute.xlu1 %v3732_v0  ;;  %764 = vperm.xlu0 %2101, %v2539_v6  }
  0xb1   :  { %578 = vperm.xlu1 %2098, %v553_v4  }
  0xb4   :  { %2104 = vset.pattern.permute.xlu0 %v3728_v10 }
  0xb5   :  { %2102 = vset.pattern.permute.xlu1 %v3729_v5  ;;  %851 = vperm.xlu0 %2104, %v553_v4  }
  0xb6   :  { %673 = vperm.xlu1 %2102, %v2539_v6  }
  0xb9   :  { %2107 = vset.pattern.permute.xlu0 %v3726_v11 }
  0xba   :  { %2103 = vset.pattern.permute.xlu1 %v3727_v7 }
  0xbb   :  { %760 = vperm.xlu1 %2103, %v553_v4  }
  0xbf   :  { %2105 = vset.pattern.permute.xlu1 %v3728_v10 }
  0xc0   :  { %855 = vperm.xlu1 %2105, %v2539_v6  }
  0xc4   :  { %2106 = vset.pattern.permute.xlu1 %v3726_v11 }
  0xc5   :  { %942 = vperm.xlu1 %2106, %v553_v4   ;;  %v402_v4 = vrot.slane %v2562_v16, %v2631_v53  ;;  %v418_v16 = vrot.slane %v2568_v19, %v2631_v53  ;;  %v2685_v19 = vrot.slane %v406_v8, %v2608_v39  ;;  %v2704_v8 = vrot.slane %v2679_v35, %v2558_v14 }
  0xc7   :  { %v2682_v44 = vrot.slane %v402_v4, %v2608_v39  ;;  %v2694_v47 = vrot.slane %v418_v16, %v2608_v39 }
 0x110   :  { %v217_v30 = vpop.permute.xlu1 %216  ;;  %v139_v34 = vpop.permute.xlu0 %138 }
 0x111   :  { %v277_v13 = vmul.f32 %v2591_v31, %v217_v30  ;;  %v278_v20 = vmul.f32 %v2594_v32, %v217_v30  ;;  %v279_v27 = vmul.f32 %v2597_v33, %v217_v30  ;;  %v280_v17 = vmul.f32 %v2602_v36, %v217_v30 }
 0x112   :  { %v281_v28 = vmul.f32 %v272_v48, %v217_v30  ;;  %v203_v29 = vmul.f32 %v182_v50, %v139_v34  ;;  %v204_v37 = vmul.f32 %v186_v54, %v139_v34  ;;  %v205_v38 = vmul.f32 %v190_v55, %v139_v34 }
 0x113   :  { %v206_v40 = vmul.f32 %v194_v56, %v139_v34  ;;  %v207_v41 = vmul.f32 %v198_v58, %v139_v34  ;;  %v282_v42 = vmul.f32 %v276_v49, %v217_v30  ;;  %v208_v43 = vmul.f32 %v202_v59, %v139_v34 }
 0x114   :  { %v221_v51 = vpop.permute.xlu1 %220  ;;  %v2629_v52 = vpop.permute.xlu0 %143  ;;  %v2700_v30 = vrot.slane %v2679_v35, %v2566_v18  ;;  %v289_v34 = vadd.f32 %v277_v13, %v203_v29  ;;  %v290_v16 = vadd.f32 %v278_v20, %v204_v37  ;;  %v291_v11 = vadd.f32 %v279_v27, %v205_v38 }
 0x115   :  { %v292_v7 = vadd.f32 %v280_v17, %v206_v40  ;;  %v293_v10 = vadd.f32 %v281_v28, %v207_v41  ;;  %v294_v5 = vadd.f32 %v282_v42, %v208_v43  ;;  %v283_v13 = vmul.f32 %v2591_v31, %v221_v51 }
 0x116   :  { %v284_v29 = vmul.f32 %v2594_v32, %v221_v51  ;;  %v285_v1 = vmul.f32 %v2597_v33, %v221_v51  ;;  %v286_v0 = vmul.f32 %v2602_v36, %v221_v51  ;;  %v287_v53 = vmul.f32 %v272_v48, %v221_v51 }
 0x117   :  { %v2718_v26 = vmul.f32 %v276_v49, %v221_v51  ;;  %v209_v25 = vmul.f32 %v182_v50, %v2629_v52  ;;  %v210_v23 = vmul.f32 %v186_v54, %v2629_v52  ;;  %v211_v20 = vmul.f32 %v190_v55, %v2629_v52 }
 0x118   :  { %v2668_v21 = vpop.permute.xlu0 %557  ;;  %v212_v27 = vmul.f32 %v194_v56, %v2629_v52  ;;  %v213_v17 = vmul.f32 %v198_v58, %v2629_v52  ;;  %v2732_v50 = vmul.f32 %v202_v59, %v2629_v52 }
 0x119   :  { %3755 = vst [vmem:[#allocation30_spill] sm:$0xff] %v2668_v21  ;;  %v2670_v22 = vpop.permute.xlu1 %306  ;;  %v295_v38 = vadd.f32 %v283_v13, %v209_v25  ;;  %v296_v6 = vadd.f32 %v284_v29, %v210_v23 }
 0x11a   :  { %v370_v25 = vmul.f32 %v2644_v61, %v2670_v22  ;;  %v298_v13 = vadd.f32 %v286_v0, %v212_v27  ;;  %v299_v29 = vadd.f32 %v287_v53, %v213_v17 }
 0x11d   :  { %v2696_v57 = vpop.permute.xlu0 %582 }
 0x11e   :  { %3756 = vst [vmem:[#allocation31_spill] sm:$0xff] %v2696_v57  ;;  %v389_v4 = vpop.permute.xlu1 %388  ;;  %v297_v57 = vadd.f32 %v285_v1, %v211_v20  ;;  %v373_v1 = vmul.f32 %v2653_v2, %v2670_v22 }
 0x11f   :  { %v449_v51 = vmul.f32 %v2675_v24, %v389_v4  ;;  %v450_v54 = vmul.f32 %v2682_v44, %v389_v4  ;;  %v451_v56 = vmul.f32 %v2685_v19, %v389_v4  ;;  %v453_v40 = vmul.f32 %v2691_v46, %v389_v4 }
 0x120   :  { %v385_v17 = vadd.f32 %v373_v1, %v299_v29  ;;  %v534_v1 = vrot.slane %v2679_v35, %v2560_v15 }
 0x122   :  { %v303_v31 = vpop.permute.xlu0 %302 }
 0x123   :  { %v363_v32 = vmul.f32 %v2641_v60, %v303_v31  ;;  %v364_v33 = vmul.f32 %v2644_v61, %v303_v31  ;;  %v365_v36 = vmul.f32 %v2647_v62, %v303_v31  ;;  %v366_v48 = vmul.f32 %v2650_v63, %v303_v31  ;;  %v2729_v49 = vpop.permute.xlu1 %477 }
 0x124   :  { %v367_v55 = vmul.f32 %v2653_v2, %v303_v31  ;;  %v368_v41 = vmul.f32 %v2656_v3, %v303_v31  ;;  %v371_v31 = vmul.f32 %v2647_v62, %v2670_v22  ;;  %v372_v62 = vmul.f32 %v2650_v63, %v2670_v22 }
 0x125   :  { %v375_v58 = vadd.f32 %v363_v32, %v289_v34  ;;  %v376_v28 = vadd.f32 %v364_v33, %v290_v16  ;;  %v377_v37 = vadd.f32 %v365_v36, %v291_v11  ;;  %v378_v52 = vadd.f32 %v366_v48, %v292_v7 }
 0x126   :  { %v379_v42 = vadd.f32 %v367_v55, %v293_v10  ;;  %v2740_v43 = vpop.permute.xlu0 %669  ;;  %v369_v34 = vmul.f32 %v2641_v60, %v2670_v22  ;;  %v452_v16 = vmul.f32 %v2688_v45, %v389_v4  ;;  %v380_v23 = vadd.f32 %v368_v41, %v294_v5 }
 0x127   :  { %v461_v59 = vadd.f32 %v449_v51, %v375_v58  ;;  %v462_v14 = vadd.f32 %v450_v54, %v376_v28  ;;  %v463_v18 = vadd.f32 %v451_v56, %v377_v37  ;;  %v2742_v21 = vpop.permute.xlu1 %482  ;;  %v454_v60 = vmul.f32 %v2694_v47, %v389_v4 }
 0x128   :  { %v465_v11 = vadd.f32 %v453_v40, %v379_v42  ;;  %v464_v20 = vadd.f32 %v452_v16, %v378_v52  ;;  %v381_v2 = vadd.f32 %v369_v34, %v295_v38  ;;  %v382_v5 = vadd.f32 %v370_v25, %v296_v6 }
 0x129   :  { %v485_v10 = vadd.f32 %v2729_v49, %v461_v59  ;;  %v487_v7 = vadd.f32 %v2729_v49, %v463_v18  ;;  %v486_v61 = vadd.f32 %v2729_v49, %v462_v14  ;;  %v383_v4 = vadd.f32 %v371_v31, %v297_v57 }
 0x12a   :  { %v489_v36 = vadd.f32 %v2729_v49, %v465_v11  ;;  %v466_v48 = vadd.f32 %v454_v60, %v380_v23  ;;  %v488_v51 = vadd.f32 %v2729_v49, %v464_v20  ;;  %v526_v38 = vrot.slane %v2679_v35, %v2608_v39 }
 0x12b   :  { %v2757_v32 = vpop.permute.xlu1 %562  ;;  %v393_v33 = vpop.permute.xlu0 %392  ;;  %v497_v18 = vmax.f32 %v485_v10, 0.0  ;;  %v499_v0 = vmax.f32 %v487_v7, 0.0  ;;  %v498_v54 = vmax.f32 %v486_v61, 0.0  ;;  %v300_v42 = vadd.f32 %v2718_v26, %v2732_v50 }
 0x12c   :  { %v455_v27 = vmul.f32 %v2675_v24, %v393_v33  ;;  %v456_v53 = vmul.f32 %v2682_v44, %v393_v33  ;;  %v457_v14 = vmul.f32 %v2685_v19, %v393_v33  ;;  %v459_v55 = vmul.f32 %v2691_v46, %v393_v33 }
 0x12d   :  { %v501_v58 = vmax.f32 %v489_v36, 0.0  ;;  %v2768_v24 = vmul.f32 %v2700_v30, %v497_v18  ;;  %v2771_v63 = vmul.f32 %v2708_v9, %v499_v0  ;;  %v458_v57 = vmul.f32 %v2688_v45, %v393_v33 }
 0x12e   :  { %v467_v56 = vadd.f32 %v455_v27, %v381_v2  ;;  %v469_v6 = vadd.f32 %v457_v14, %v383_v4  ;;  %v468_v28 = vadd.f32 %v456_v53, %v382_v5  ;;  %v471_v37 = vadd.f32 %v459_v55, %v385_v17 }
 0x12f   :  { %v374_v52 = vmul.f32 %v2656_v3, %v2670_v22  ;;  %v384_v45 = vadd.f32 %v372_v62, %v298_v13  ;;  %v490_v34 = vadd.f32 %v2729_v49, %v466_v48  ;;  %v500_v11 = vmax.f32 %v488_v51, 0.0 }
 0x130   :  { %v579_v44 = vpop.permute.xlu1 %578  ;;  %v491_v19 = vadd.f32 %v2742_v21, %v467_v56  ;;  %v493_v46 = vadd.f32 %v2742_v21, %v469_v6  ;;  %v2786_v25 = vmul.f32 %v2704_v8, %v498_v54  ;;  %v2789_v16 = vmul.f32 %v2712_v12, %v501_v58 }
 0x131   :  { %v587_v40 = vmul.f32 %v579_v44, %v2771_v63  ;;  %v585_v41 = vmul.f32 %v579_v44, %v2768_v24  ;;  %v460_v26 = vmul.f32 %v2694_v47, %v393_v33  ;;  %v470_v50 = vadd.f32 %v458_v57, %v384_v45  ;;  %v3757_v33 = vld [vmem:[#allocation31_spill] sm:$0xff] }
 0x132   :  { %v503_v59 = vmax.f32 %v491_v19, 0.0  ;;  %v492_v3 = vadd.f32 %v2742_v21, %v468_v28  ;;  %v495_v22 = vadd.f32 %v2742_v21, %v471_v37  ;;  %v505_v49 = vmax.f32 %v493_v46, 0.0 }
 0x133   :  { %613 = vrot.lane.b32.xlu0 %v587_v40, %s2364_s7  ;;  %609 = vrot.lane.b32.xlu1 %v585_v41, %s2364_s7  ;;  %v589_v7 = vmul.f32 %v579_v44, %v2789_v16  ;;  %v586_v13 = vmul.f32 %v579_v44, %v2786_v25  ;;  %v386_v31 = vadd.f32 %v374_v52, %v300_v42  ;;  %v502_v23 = vmax.f32 %v490_v34, 0.0  ;;  %v765_v41 = vpop.permute.xlu0 %764 }
 0x134   :  { %v2797_v10 = vmul.f32 %v2700_v30, %v503_v59  ;;  %v2803_v29 = vmul.f32 %v526_v38, %v500_v11  ;;  %v494_v60 = vadd.f32 %v2742_v21, %v470_v50  ;;  %v504_v30 = vmax.f32 %v492_v3, 0.0 }
 0x135   :  { %v472_v47 = vadd.f32 %v460_v26, %v386_v31  ;;  %v507_v20 = vmax.f32 %v495_v22, 0.0  ;;  %v2809_v61 = vmul.f32 %v2708_v9, %v505_v49  ;;  %v2814_v18 = vmul.f32 %v534_v1, %v502_v23  ;;  %v674_v56 = vpop.permute.xlu1 %673 }
 0x136   :  { %v591_v36 = vmul.f32 %v3757_v33, %v2797_v10  ;;  %v588_v35 = vmul.f32 %v579_v44, %v2803_v29  ;;  %v506_v27 = vmax.f32 %v494_v60, 0.0  ;;  %v2820_v62 = vmul.f32 %v2704_v8, %v504_v30 }
 0x137   :  { %617 = vrot.lane.b32.xlu0 %v589_v7, %s2364_s7  ;;  %611 = vrot.lane.b32.xlu1 %v586_v13, %s2364_s7  ;;  %v496_v0 = vadd.f32 %v2742_v21, %v472_v47  ;;  %v2823_v9 = vmul.f32 %v2712_v12, %v507_v20  ;;  %v593_v2 = vmul.f32 %v3757_v33, %v2809_v61  ;;  %v852_v26 = vpop.permute.xlu0 %851 }
 0x138   :  { %v590_v5 = vmul.f32 %v579_v44, %v2814_v18  ;;  %v2830_v4 = vmul.f32 %v526_v38, %v506_v27  ;;  %v592_v8 = vmul.f32 %v3757_v33, %v2820_v62  ;;  %v677_v17 = vmul.f32 %v2740_v43, %v2786_v25 }
 0x139   :  { %v508_v53 = vmax.f32 %v496_v0, 0.0  ;;  %v595_v21 = vmul.f32 %v3757_v33, %v2823_v9  ;;  %v679_v14 = vmul.f32 %v2740_v43, %v2803_v29  ;;  %v681_v54 = vmul.f32 %v2740_v43, %v2814_v18 }
 0x13a   :  { %v594_v48 = vmul.f32 %v3757_v33, %v2830_v4  ;;  %v676_v55 = vmul.f32 %v2740_v43, %v2768_v24  ;;  %v683_v58 = vmul.f32 %v674_v56, %v2820_v62  ;;  %v678_v6 = vmul.f32 %v2740_v43, %v2771_v63  ;;  %v761_v19 = vpop.permute.xlu1 %760 }
 0x13b   :  { %621 = vrot.lane.b32.xlu0 %v591_v36, %s2364_s7  ;;  %615 = vrot.lane.b32.xlu1 %v588_v35, %s2364_s7  ;;  %v2838_v12 = vmul.f32 %v534_v1, %v508_v53  ;;  %v685_v44 = vmul.f32 %v674_v56, %v2830_v4  ;;  %v680_v57 = vmul.f32 %v2740_v43, %v2789_v16  ;;  %v3758_v35 = vld [vmem:[#allocation23_spill] sm:$0xff] }
 0x13c   :  { %v682_v37 = vmul.f32 %v674_v56, %v2797_v10  ;;  %v769_v38 = vmul.f32 %v761_v19, %v2771_v63  ;;  %v684_v46 = vmul.f32 %v674_v56, %v2809_v61  ;;  %v771_v43 = vmul.f32 %v761_v19, %v2789_v16 }
 0x13d   :  { %v596_v51 = vmul.f32 %v3757_v33, %v2838_v12  ;;  %v687_v28 = vmul.f32 %v674_v56, %v2838_v12  ;;  %v686_v40 = vmul.f32 %v674_v56, %v2823_v9  ;;  %v773_v42 = vmul.f32 %v765_v41, %v2797_v10 }
 0x13e   :  { %v767_v52 = vmul.f32 %v761_v19, %v2768_v24  ;;  %v775_v45 = vmul.f32 %v765_v41, %v2809_v61  ;;  %v768_v59 = vmul.f32 %v761_v19, %v2786_v25  ;;  %v777_v34 = vmul.f32 %v765_v41, %v2823_v9 }
 0x13f   :  { %625 = vrot.lane.b32.xlu0 %v593_v2, %s2364_s7  ;;  %619 = vrot.lane.b32.xlu1 %v590_v5, %s2364_s7  ;;  %v770_v11 = vmul.f32 %v761_v19, %v2803_v29  ;;  %v859_v50 = vmul.f32 %v852_v26, %v2786_v25  ;;  %v772_v3 = vmul.f32 %v761_v19, %v2814_v18  ;;  %v856_v31 = vpop.permute.xlu1 %855 }
 0x140   :  { %v861_v22 = vmul.f32 %v852_v26, %v2803_v29  ;;  %v774_v49 = vmul.f32 %v765_v41, %v2820_v62  ;;  %v863_v7 = vmul.f32 %v852_v26, %v2814_v18  ;;  %v776_v13 = vmul.f32 %v765_v41, %v2830_v4 }
 0x141   :  { %v865_v1 = vmul.f32 %v856_v31, %v2820_v62  ;;  %v778_v23 = vmul.f32 %v765_v41, %v2838_v12  ;;  %v867_v47 = vmul.f32 %v856_v31, %v2830_v4  ;;  %v858_v60 = vmul.f32 %v852_v26, %v2768_v24 }
 0x142   :  { %v869_v30 = vmul.f32 %v856_v31, %v2838_v12  ;;  %v860_v20 = vmul.f32 %v852_v26, %v2771_v63  ;;  %v862_v33 = vmul.f32 %v852_v26, %v2789_v16  ;;  %v864_v27 = vmul.f32 %v856_v31, %v2797_v10 }
 0x143   :  { %629 = vrot.lane.b32.xlu0 %v595_v21, %s2364_s7  ;;  %623 = vrot.lane.b32.xlu1 %v592_v8, %s2364_s7  ;;  %v866_v5 = vmul.f32 %v856_v31, %v2809_v61  ;;  %v868_v53 = vmul.f32 %v856_v31, %v2823_v9  ;;  %v2369_v21 = vmov 6  }
 0x144   :  { %v943_v36 = vpop.permute.xlu1 %942  ;;  %2109 = vset.pattern.permute.xlu1 %v2369_v21 }
 0x145   :  { %v951_v0 = vmul.f32 %v943_v36, %v2771_v63  ;;  %v953_v2 = vmul.f32 %v943_v36, %v2789_v16  ;;  %v949_v8 = vmul.f32 %v943_v36, %v2768_v24 }
 0x147   :  { %702 = vrot.lane.b32.xlu0 %v677_v17, %s2365_s1  ;;  %627 = vrot.lane.b32.xlu1 %v594_v48, %s2364_s7  ;;  %v950_v17 = vmul.f32 %v943_v36, %v2786_v25  ;;  %v952_v48 = vmul.f32 %v943_v36, %v2803_v29 }
 0x14b   :  { %706 = vrot.lane.b32.xlu0 %v679_v14, %s2365_s1  ;;  %631 = vrot.lane.b32.xlu1 %v596_v51, %s2364_s7 }
 0x14f   :  { %710 = vrot.lane.b32.xlu0 %v681_v54, %s2365_s1  ;;  %700 = vrot.lane.b32.xlu1 %v676_v55, %s2365_s1  ;;  %v954_v54 = vmul.f32 %v943_v36, %v2814_v18 }
 0x153   :  { %714 = vrot.lane.b32.xlu0 %v683_v58, %s2365_s1  ;;  %704 = vrot.lane.b32.xlu1 %v678_v6, %s2365_s1 }
 0x157   :  { %718 = vrot.lane.b32.xlu0 %v685_v44, %s2365_s1  ;;  %708 = vrot.lane.b32.xlu1 %v680_v57, %s2365_s1 }
 0x15b   :  { %722 = vrot.lane.b32.xlu0 %v687_v28, %s2365_s1  ;;  %712 = vrot.lane.b32.xlu1 %v682_v37, %s2365_s1 }
 0x15f   :  { %795 = vrot.lane.b32.xlu0 %v769_v38, %s2366_s28  ;;  %716 = vrot.lane.b32.xlu1 %v684_v46, %s2365_s1 }
 0x163   :  { %799 = vrot.lane.b32.xlu0 %v771_v43, %s2366_s28  ;;  %720 = vrot.lane.b32.xlu1 %v686_v40, %s2365_s1 }
 0x167   :  { %803 = vrot.lane.b32.xlu0 %v773_v42, %s2366_s28  ;;  %791 = vrot.lane.b32.xlu1 %v767_v52, %s2366_s28 }
 0x16b   :  { %807 = vrot.lane.b32.xlu0 %v775_v45, %s2366_s28  ;;  %793 = vrot.lane.b32.xlu1 %v768_v59, %s2366_s28 }
 0x16f   :  { %811 = vrot.lane.b32.xlu0 %v777_v34, %s2366_s28  ;;  %797 = vrot.lane.b32.xlu1 %v770_v11, %s2366_s28 }
 0x173   :  { %884 = vrot.lane.b32.xlu0 %v859_v50, %s2367_s9  ;;  %801 = vrot.lane.b32.xlu1 %v772_v3, %s2366_s28 }
 0x177   :  { %888 = vrot.lane.b32.xlu0 %v861_v22, %s2367_s9  ;;  %805 = vrot.lane.b32.xlu1 %v774_v49, %s2366_s28 }
 0x17b   :  { %892 = vrot.lane.b32.xlu0 %v863_v7, %s2367_s9  ;;  %809 = vrot.lane.b32.xlu1 %v776_v13, %s2366_s28 }
 0x17f   :  { %896 = vrot.lane.b32.xlu0 %v865_v1, %s2367_s9  ;;  %813 = vrot.lane.b32.xlu1 %v778_v23, %s2366_s28 }
 0x183   :  { %900 = vrot.lane.b32.xlu0 %v867_v47, %s2367_s9  ;;  %882 = vrot.lane.b32.xlu1 %v858_v60, %s2367_s9 }
 0x187   :  { %904 = vrot.lane.b32.xlu0 %v869_v30, %s2367_s9  ;;  %886 = vrot.lane.b32.xlu1 %v860_v20, %s2367_s9  ;;  %v571_v30 = vmul.f32 %v2757_v32, %v2797_v10  ;;  %v572_v20 = vmul.f32 %v2757_v32, %v2820_v62 }
 0x18b   :  { %946 = vperm.xlu0 %2107, %v3758_v35   ;;  %890 = vrot.lane.b32.xlu1 %v862_v33, %s2367_s9 }
 0x18f   :  { %977 = vrot.lane.b32.xlu0 %v951_v0, %s2368_s5  ;;  %894 = vrot.lane.b32.xlu1 %v864_v27, %s2367_s9 }
 0x190   :  { %2108 = vset.pattern.permute.xlu0 %v2369_v21 }
 0x193   :  { %981 = vrot.lane.b32.xlu0 %v953_v2, %s2368_s5  ;;  %898 = vrot.lane.b32.xlu1 %v866_v5, %s2367_s9  ;;  %v573_v5 = vmul.f32 %v2757_v32, %v2809_v61 }
 0x197   :  { %902 = vrot.lane.b32.xlu1 %v868_v53, %s2367_s9 }
 0x19b   :  { %973 = vrot.lane.b32.xlu1 %v949_v8, %s2368_s5 }
 0x19f   :  { %975 = vrot.lane.b32.xlu1 %v950_v17, %s2368_s5  ;;  %v574_v17 = vmul.f32 %v2757_v32, %v2830_v4 }
 0x1a3   :  { %979 = vrot.lane.b32.xlu1 %v952_v48, %s2368_s5 }
 0x1a5   :  { %v2937_v14 = vpop.permute.xlu0 %613  ;;  %v2939_v51 = vpop.permute.xlu1 %609 }
 0x1a7   :  { %983 = vrot.lane.b32.xlu1 %v954_v54, %s2368_s5 }
 0x1a9   :  { %v2943_v55 = vpop.permute.xlu0 %617  ;;  %v2945_v56 = vpop.permute.xlu1 %611 }
 0x1ad   :  { %v622_v58 = vpop.permute.xlu0 %621  ;;  %v2947_v6 = vpop.permute.xlu1 %615 }
 0x1b1   :  { %v626_v44 = vpop.permute.xlu0 %625  ;;  %v2949_v57 = vpop.permute.xlu1 %619 }
 0x1b5   :  { %v630_v28 = vpop.permute.xlu0 %629  ;;  %v624_v37 = vpop.permute.xlu1 %623 }
 0x1b6   :  { %v639_v47 = vsel %vm633_vm0, %v622_v58, %v624_v37  ;;  %v640_v60 = vsel %vm633_vm0, %v624_v37, %v626_v44 }
 0x1b7   :  { %v662_v27 = vadd.f32 %v639_v47, %v571_v30  ;;  %v663_v2 = vadd.f32 %v640_v60, %v572_v20 }
 0x1b9   :  { %v2951_v19 = vpop.permute.xlu0 %702  ;;  %v628_v38 = vpop.permute.xlu1 %627 }
 0x1ba   :  { %v641_v53 = vsel %vm633_vm0, %v626_v44, %v628_v38  ;;  %v642_v8 = vsel %vm633_vm0, %v628_v38, %v630_v28 }
 0x1bb   :  { %v664_v44 = vadd.f32 %v641_v53, %v573_v5  ;;  %v665_v30 = vadd.f32 %v642_v8, %v574_v17 }
 0x1bd   :  { %v2953_v46 = vpop.permute.xlu0 %706  ;;  %v2955_v43 = vpop.permute.xlu1 %631 }
 0x1c1   :  { %v2957_v40 = vpop.permute.xlu0 %710  ;;  %v2959_v41 = vpop.permute.xlu1 %700 }
 0x1c5   :  { %v715_v42 = vpop.permute.xlu0 %714  ;;  %v2961_v52 = vpop.permute.xlu1 %704 }
 0x1c9   :  { %v719_v45 = vpop.permute.xlu0 %718  ;;  %v2963_v59 = vpop.permute.xlu1 %708 }
 0x1cd   :  { %v2965_v34 = vpop.permute.xlu0 %722  ;;  %v713_v11 = vpop.permute.xlu1 %712 }
 0x1ce   :  { %v730_v35 = vsel %vm724_vm1, %v713_v11, %v715_v42 }
 0x1cf   :  { %v753_v48 = vadd.f32 %v730_v35, %v662_v27  ;;  %v643_v35 = vsel %vm633_vm0, %v630_v28, %v2955_v43 }
 0x1d1   :  { %v2967_v26 = vpop.permute.xlu0 %795  ;;  %v717_v50 = vpop.permute.xlu1 %716 }
 0x1d2   :  { %v731_v0 = vsel %vm724_vm1, %v715_v42, %v717_v50  ;;  %v732_v42 = vsel %vm724_vm1, %v717_v50, %v719_v45 }
 0x1d3   :  { %v754_v54 = vadd.f32 %v731_v0, %v663_v2  ;;  %v575_v0 = vmul.f32 %v2757_v32, %v2823_v9  ;;  %v755_v27 = vadd.f32 %v732_v42, %v664_v44  ;;  %v635_v42 = vsel %vm633_vm0, %v2945_v56, %v2937_v14 }
 0x1d5   :  { %v2969_v3 = vpop.permute.xlu0 %799  ;;  %v721_v22 = vpop.permute.xlu1 %720  ;;  %v666_v8 = vadd.f32 %v643_v35, %v575_v0  ;;  %v726_v0 = vsel %vm724_vm1, %v2951_v19, %v2961_v52 }
 0x1d6   :  { %v733_v11 = vsel %vm724_vm1, %v719_v45, %v721_v22 }
 0x1d7   :  { %v756_v50 = vadd.f32 %v733_v11, %v665_v30  ;;  %v636_v11 = vsel %vm633_vm0, %v2937_v14, %v2947_v6  ;;  %v727_v14 = vsel %vm724_vm1, %v2961_v52, %v2953_v46 }
 0x1d9   :  { %v804_v49 = vpop.permute.xlu0 %803  ;;  %v2971_v7 = vpop.permute.xlu1 %791 }
 0x1dd   :  { %v808_v13 = vpop.permute.xlu0 %807  ;;  %v2973_v31 = vpop.permute.xlu1 %793 }
 0x1de   :  { %v817_v52 = vsel %vm815_vm2, %v2973_v31, %v2967_v26 }
 0x1e1   :  { %v812_v1 = vpop.permute.xlu0 %811  ;;  %v2975_v23 = vpop.permute.xlu1 %797 }
 0x1e5   :  { %v2983_v33 = vpop.permute.xlu0 %884  ;;  %v2985_v36 = vpop.permute.xlu1 %801 }
 0x1e9   :  { %v2995_v58 = vpop.permute.xlu0 %888  ;;  %v806_v37 = vpop.permute.xlu1 %805 }
 0x1ea   :  { %v821_v47 = vsel %vm815_vm2, %v804_v49, %v806_v37  ;;  %v822_v60 = vsel %vm815_vm2, %v806_v37, %v808_v13  ;;  %v734_v49 = vsel %vm724_vm1, %v721_v22, %v2965_v34  ;;  %v576_v22 = vmul.f32 %v2757_v32, %v2838_v12 }
 0x1eb   :  { %v3001_v38 = vadd.f32 %v821_v47, %v753_v48  ;;  %v3003_v20 = vadd.f32 %v822_v60, %v754_v54  ;;  %v757_v28 = vadd.f32 %v734_v49, %v666_v8  ;;  %v3759_v47 = vld [vmem:[#allocation30_spill] sm:$0xff] }
 0x1ec   :  { %v566_v60 = vmul.f32 %v3759_v47, %v2786_v25  ;;  %v567_v44 = vmul.f32 %v3759_v47, %v2771_v63  ;;  %v667_v35 = vadd.f32 %v2955_v43, %v576_v22  ;;  %v638_v43 = vsel %vm633_vm0, %v2943_v55, %v2949_v57 }
 0x1ed   :  { %v3009_v2 = vpop.permute.xlu0 %892  ;;  %v810_v45 = vpop.permute.xlu1 %809 }
 0x1ee   :  { %v823_v5 = vsel %vm815_vm2, %v808_v13, %v810_v45  ;;  %v824_v53 = vsel %vm815_vm2, %v810_v45, %v812_v1  ;;  %v657_v32 = vadd.f32 %v635_v42, %v566_v60 }
 0x1ef   :  { %v846_v17 = vadd.f32 %v823_v5, %v755_v27  ;;  %v3015_v48 = vadd.f32 %v824_v53, %v756_v50  ;;  %v637_v27 = vsel %vm633_vm0, %v2947_v6, %v2943_v55  ;;  %v658_v50 = vadd.f32 %v636_v11, %v567_v44 }
 0x1f0   :  { %v758_v5 = vadd.f32 %v2965_v34, %v667_v35  ;;  %v818_v53 = vsel %vm815_vm2, %v2967_v26, %v2975_v23  ;;  %v569_v6 = vmul.f32 %v3759_v47, %v2789_v16  ;;  %v748_v8 = vadd.f32 %v726_v0, %v657_v32 }
 0x1f1   :  { %v897_v54 = vpop.permute.xlu0 %896  ;;  %v814_v37 = vpop.permute.xlu1 %813  ;;  %v728_v55 = vsel %vm724_vm1, %v2953_v46, %v2963_v59  ;;  %v729_v34 = vsel %vm724_vm1, %v2963_v59, %v2957_v40  ;;  %v819_v26 = vsel %vm815_vm2, %v2975_v23, %v2969_v3  ;;  %v820_v0 = vsel %vm815_vm2, %v2969_v3, %v2985_v36 }
 0x1f2   :  { %v825_v13 = vsel %vm815_vm2, %v812_v1, %v814_v37  ;;  %v568_v1 = vmul.f32 %v3759_v47, %v2803_v29  ;;  %v849_v11 = vadd.f32 %v814_v37, %v758_v5  ;;  %v660_v22 = vadd.f32 %v638_v43, %v569_v6 }
 0x1f3   :  { %v848_v30 = vadd.f32 %v825_v13, %v757_v28  ;;  %v749_v28 = vadd.f32 %v727_v14, %v658_v50  ;;  %v839_v13 = vadd.f32 %v817_v52, %v748_v8 }
 0x1f4   :  { %v659_v42 = vadd.f32 %v637_v27, %v568_v1  ;;  %v751_v32 = vadd.f32 %v729_v34, %v660_v22 }
 0x1f5   :  { %v901_v45 = vpop.permute.xlu0 %900  ;;  %v883_v49 = vpop.permute.xlu1 %882  ;;  %v840_v60 = vadd.f32 %v818_v53, %v749_v28 }
 0x1f6   :  { %v750_v37 = vadd.f32 %v728_v55, %v659_v42  ;;  %v842_v50 = vadd.f32 %v820_v0, %v751_v32 }
 0x1f8   :  { %v841_v23 = vadd.f32 %v819_v26, %v750_v37 }
 0x1f9   :  { %v905_v44 = vpop.permute.xlu0 %904  ;;  %v887_v35 = vpop.permute.xlu1 %886 }
 0x1fa   :  { %v3066_v14 = vadd.f32 %v905_v44, %v849_v11  ;;  %v908_v46 = vsel %vm906_vm3, %v2983_v33, %v887_v35  ;;  %v909_v59 = vsel %vm906_vm3, %v887_v35, %v2995_v58 }
 0x1fb   :  { %v930_v1 = vadd.f32 %v908_v46, %v839_v13  ;;  %v931_v27 = vadd.f32 %v909_v59, %v840_v60  ;;  %v565_v13 = vmul.f32 %v3759_v47, %v2768_v24 }
 0x1fd   :  { %v891_v43 = vpop.permute.xlu1 %890 }
 0x1fe   :  { %v910_v5 = vsel %vm906_vm3, %v2995_v58, %v891_v43  ;;  %v911_v3 = vsel %vm906_vm3, %v891_v43, %v3009_v2  ;;  %v634_v58 = vsel %vm633_vm0, %v2939_v51, %v2945_v56 }
 0x1ff   :  { %v932_v52 = vadd.f32 %v910_v5, %v841_v23  ;;  %v3076_v53 = vadd.f32 %v911_v3, %v842_v50  ;;  %v656_v60 = vadd.f32 %v634_v58, %v565_v13  ;;  %v2371_v58 = vmov 8  }
 0x201   :  { %v895_v6 = vpop.permute.xlu1 %894 }
 0x202   :  { %v912_v8 = vsel %vm906_vm3, %v895_v6, %v897_v54 }
 0x203   :  { %v935_v28 = vadd.f32 %v912_v8, %v3001_v38  ;;  %v725_v38 = vsel %vm724_vm1, %v2959_v41, %v2951_v19  ;;  %v907_v41 = vsel %vm906_vm3, %v883_v49, %v2983_v33 }
 0x204   :  { %v747_v59 = vadd.f32 %v725_v38, %v656_v60 }
 0x205   :  { %v899_v42 = vpop.permute.xlu1 %898 }
 0x206   :  { %v913_v55 = vsel %vm906_vm3, %v897_v54, %v899_v42  ;;  %v914_v34 = vsel %vm906_vm3, %v899_v42, %v901_v45  ;;  %v2133_v42 = vld [vmem:[#allocation8] sm:$0xff] }
 0x207   :  { %v936_v11 = vadd.f32 %v913_v55, %v3003_v20  ;;  %v937_v22 = vadd.f32 %v914_v34, %v846_v17  ;;  %v816_v17 = vsel %vm815_vm2, %v2971_v7, %v2973_v31  ;;  %v2134_v55 = vld [vmem:[#allocation8 + $0x8] sm:$0xff]  ;;  %v2370_v34 = vmov 7  }
 0x209   :  { %v903_v26 = vpop.permute.xlu1 %902 }
 0x20a   :  { %v915_v54 = vsel %vm906_vm3, %v901_v45, %v903_v26  ;;  %v916_v35 = vsel %vm906_vm3, %v903_v26, %v905_v44  ;;  %v947_v0 = vpop.permute.xlu0 %946  ;;  %v838_v45 = vadd.f32 %v816_v17, %v747_v59 }
 0x20b   :  { %v938_v46 = vadd.f32 %v915_v54, %v3015_v48  ;;  %v939_v51 = vadd.f32 %v916_v35, %v848_v30  ;;  %v955_v56 = vmul.f32 %v947_v0, %v2797_v10  ;;  %v956_v20 = vmul.f32 %v947_v0, %v2820_v62 }
 0x20c   :  { %v957_v30 = vmul.f32 %v947_v0, %v2809_v61  ;;  %v958_v44 = vmul.f32 %v947_v0, %v2830_v4  ;;  %v929_v37 = vadd.f32 %v907_v41, %v838_v45  ;;  %v959_v49 = vmul.f32 %v947_v0, %v2823_v9 }
 0x20d   :  { %985 = vrot.lane.b32.xlu0 %v955_v56, %s2368_s5  ;;  %987 = vrot.lane.b32.xlu1 %v956_v20, %s2368_s5  ;;  %v974_v19 = vpop.permute.xlu1 %973  ;;  %v960_v50 = vmul.f32 %v947_v0, %v2838_v12 }
 0x20e   :  { %v978_v48 = vpop.permute.xlu0 %977 }
 0x211   :  { %989 = vrot.lane.b32.xlu0 %v957_v30, %s2368_s5  ;;  %991 = vrot.lane.b32.xlu1 %v958_v44, %s2368_s5  ;;  %v976_v7 = vpop.permute.xlu1 %975 }
 0x212   :  { %v998_v31 = vsel %vm997_vm4, %v974_v19, %v976_v7  ;;  %v999_v32 = vsel %vm997_vm4, %v976_v7, %v978_v48  ;;  %v3115_v43 = vpop.permute.xlu0 %981 }
 0x213   :  { %v3109_v23 = vadd.f32 %v998_v31, %v929_v37  ;;  %v3111_v33 = vadd.f32 %v999_v32, %v930_v1 }
 0x215   :  { %993 = vrot.lane.b32.xlu0 %v959_v49, %s2368_s5  ;;  %995 = vrot.lane.b32.xlu1 %v960_v50, %s2368_s5  ;;  %v980_v5 = vpop.permute.xlu1 %979 }
 0x216   :  { %v1000_v3 = vsel %vm997_vm4, %v978_v48, %v980_v5  ;;  %v1001_v6 = vsel %vm997_vm4, %v980_v5, %v3115_v43  ;;  %v3761_v5 = vmov 0  }
 0x217   :  { %v3122_v8 = vadd.f32 %v1000_v3, %v931_v27  ;;  %v3124_v1 = vadd.f32 %v1001_v6, %v932_v52 }
 0x219   :  { %1033 = vperm.xlu0 %2108, %v2133_v42   ;;  %1037 = vperm.xlu1 %2109, %v2134_v55   ;;  %v3128_v13 = vpop.permute.xlu1 %983 }
 0x21d   :  { %2110 = vset.pattern.permute.xlu0 %v2370_v34  ;;  %2111 = vset.pattern.permute.xlu1 %v2371_v58 }
 0x21e   :  { %1124 = vperm.xlu0 %2110, %v2133_v42  }
 0x27f   :  { %v986_v26 = vpop.permute.xlu0 %985  ;;  %v988_v60 = vpop.permute.xlu1 %987 }
 0x280   :  { %v1003_v27 = vsel %vm997_vm4, %v986_v26, %v988_v60 }
 0x281   :  { %v3131_v38 = vadd.f32 %v1003_v27, %v935_v28 }
 0x283   :  { %v990_v52 = vpop.permute.xlu0 %989  ;;  %v992_v54 = vpop.permute.xlu1 %991 }
 0x284   :  { %v1004_v35 = vsel %vm997_vm4, %v988_v60, %v990_v52  ;;  %v1005_v0 = vsel %vm997_vm4, %v990_v52, %v992_v54 }
 0x285   :  { %v3135_v56 = vadd.f32 %v1004_v35, %v936_v11  ;;  %v3137_v20 = vadd.f32 %v1005_v0, %v937_v22 }
 0x287   :  { %v994_v17 = vpop.permute.xlu0 %993  ;;  %v996_v59 = vpop.permute.xlu1 %995 }
 0x288   :  { %v1006_v19 = vsel %vm997_vm4, %v992_v54, %v994_v17  ;;  %v1007_v41 = vsel %vm997_vm4, %v994_v17, %v996_v59  ;;  %v3142_v45 = vadd.f32 %v996_v59, %v3066_v14 }
 0x289   :  { %v3144_v28 = vadd.f32 %v1006_v19, %v938_v46  ;;  %v3146_v48 = vadd.f32 %v1007_v41, %v939_v51  ;;  %v3760_v51 = vmov 1  }
 0x298   :  { %v1034_v30 = vpop.permute.xlu0 %1033  ;;  %v1038_v46 = vpop.permute.xlu1 %1037 }
 0x299   :  { %v1042_v44 = vmul.f32 %v1034_v30, %v2771_v63  ;;  %v1040_v11 = vmul.f32 %v1034_v30, %v2768_v24  ;;  %v1044_v22 = vmul.f32 %v1034_v30, %v2789_v16  ;;  %v1041_v14 = vmul.f32 %v1034_v30, %v2786_v25 }
 0x29a   :  { %v1043_v37 = vmul.f32 %v1034_v30, %v2803_v29  ;;  %v1046_v7 = vmul.f32 %v1038_v46, %v2797_v10  ;;  %v1048_v31 = vmul.f32 %v1038_v46, %v2809_v61  ;;  %v1045_v32 = vmul.f32 %v1034_v30, %v2814_v18 }
 0x29b   :  { %1068 = vrot.lane.b32.xlu0 %v1042_v44, %s2372_s2  ;;  %1064 = vrot.lane.b32.xlu1 %v1040_v11, %s2372_s2  ;;  %v1050_v49 = vmul.f32 %v1038_v46, %v2823_v9  ;;  %v1047_v3 = vmul.f32 %v1038_v46, %v2820_v62  ;;  %v1051_v26 = vmul.f32 %v1038_v46, %v2838_v12 }
 0x29c   :  { %v570_v30 = vmul.f32 %v3759_v47, %v2814_v18 }
 0x29d   :  { %v1125_v50 = vpop.permute.xlu0 %1124 }
 0x29e   :  { %v1131_v6 = vmul.f32 %v1125_v50, %v2768_v24  ;;  %v1135_v60 = vmul.f32 %v1125_v50, %v2789_v16  ;;  %v1132_v27 = vmul.f32 %v1125_v50, %v2786_v25  ;;  %v1134_v52 = vmul.f32 %v1125_v50, %v2803_v29 }
 0x29f   :  { %1128 = vperm.xlu0 %2110, %v2134_v55   ;;  %1215 = vperm.xlu1 %2111, %v2133_v42   ;;  %v1049_v42 = vmul.f32 %v1038_v46, %v2830_v4  ;;  %v1136_v54 = vmul.f32 %v1125_v50, %v2814_v18 }
 0x2a3   :  { %1072 = vrot.lane.b32.xlu0 %v1044_v22, %s2372_s2  ;;  %1066 = vrot.lane.b32.xlu1 %v1041_v14, %s2372_s2 }
 0x2a4   :  { %2113 = vset.pattern.permute.xlu0 %v3760_v51  ;;  %v661_v51 = vadd.f32 %v2949_v57, %v570_v30 }
 0x2a6   :  { %v752_v47 = vadd.f32 %v2957_v40, %v661_v51 }
 0x2a7   :  { %1070 = vrot.lane.b32.xlu1 %v1043_v37, %s2372_s2  ;;  %1076 = vrot.lane.b32.xlu0 %v1046_v7, %s2372_s2 }
 0x2ab   :  { %1219 = vperm.xlu1 %2111, %v2134_v55   ;;  %1080 = vrot.lane.b32.xlu0 %v1048_v31, %s2372_s2  ;;  %v1133_v55 = vmul.f32 %v1125_v50, %v2771_v63 }
 0x2af   :  { %1074 = vrot.lane.b32.xlu1 %v1045_v32, %s2372_s2  ;;  %1084 = vrot.lane.b32.xlu0 %v1050_v49, %s2372_s2 }
 0x2b0   :  { %2112 = vset.pattern.permute.xlu1 %v3761_v5 }
 0x2b3   :  { %1078 = vrot.lane.b32.xlu1 %v1047_v3, %s2372_s2  ;;  %1155 = vrot.lane.b32.xlu0 %v1131_v6, %s2373_s25  ;;  %v843_v6 = vadd.f32 %v2985_v36, %v752_v47  ;;  %v2135_v47 = vld [vmem:[#allocation2 + $0x8] sm:$0xff] }
 0x2b7   :  { %1082 = vrot.lane.b32.xlu1 %v1049_v42, %s2372_s2  ;;  %1159 = vrot.lane.b32.xlu0 %v1133_v55, %s2373_s25  ;;  %v1305_v55 = vld [vmem:[#allocation10] sm:$0xff] }
 0x2bb   :  { %1086 = vrot.lane.b32.xlu1 %v1051_v26, %s2372_s2  ;;  %1163 = vrot.lane.b32.xlu0 %v1135_v60, %s2373_s25  ;;  %v934_v26 = vadd.f32 %v3009_v2, %v843_v6  ;;  %v1990_v6 = vcombine.high %v2135_v47, %v2135_v47 }
 0x2bd   :  { %v1025_v60 = vadd.f32 %v3128_v13, %v934_v26 }
 0x2bf   :  { %1157 = vrot.lane.b32.xlu1 %v1132_v27, %s2373_s25 }
 0x2c3   :  { %1161 = vrot.lane.b32.xlu1 %v1134_v52, %s2373_s25 }
 0x2c7   :  { %1165 = vrot.lane.b32.xlu1 %v1136_v54, %s2373_s25 }
 0x30d   :  { %v1069_v35 = vpop.permute.xlu0 %1068  ;;  %v1065_v0 = vpop.permute.xlu1 %1064 }
 0x31e   :  { %v1129_v17 = vpop.permute.xlu0 %1128  ;;  %v3186_v59 = vpop.permute.xlu1 %1215 }
 0x31f   :  { %v1138_v19 = vmul.f32 %v1129_v17, %v2820_v62  ;;  %v1137_v41 = vmul.f32 %v1129_v17, %v2797_v10  ;;  %v1140_v14 = vmul.f32 %v1129_v17, %v2830_v4  ;;  %v1139_v46 = vmul.f32 %v1129_v17, %v2809_v61 }
 0x320   :  { %v1142_v57 = vmul.f32 %v1129_v17, %v2838_v12  ;;  %v1141_v3 = vmul.f32 %v1129_v17, %v2823_v9  ;;  %v1224_v2 = vmul.f32 %v3186_v59, %v2771_v63  ;;  %v1226_v17 = vmul.f32 %v3186_v59, %v2789_v16 }
 0x321   :  { %1169 = vrot.lane.b32.xlu1 %v1138_v19, %s2373_s25  ;;  %1167 = vrot.lane.b32.xlu0 %v1137_v41, %s2373_s25  ;;  %v1225_v63 = vmul.f32 %v3186_v59, %v2803_v29  ;;  %v1227_v29 = vmul.f32 %v3186_v59, %v2814_v18  ;;  %v3762_v18 = vmov 2  }
 0x322   :  { %v1067_v44 = vpop.permute.xlu1 %1066  ;;  %v1073_v37 = vpop.permute.xlu0 %1072 }
 0x323   :  { %v1089_v11 = vsel %vm1088_vm5, %v1065_v0, %v1067_v44  ;;  %v1090_v22 = vsel %vm1088_vm5, %v1067_v44, %v1069_v35  ;;  %v3257_v44 = vld [vmem:[#allocation11] sm:$0xf] }
 0x324   :  { %v3200_v7 = vadd.f32 %v1089_v11, %v3109_v23  ;;  %v3203_v31 = vadd.f32 %v1090_v22, %v3111_v33 }
 0x325   :  { %1173 = vrot.lane.b32.xlu1 %v1140_v14, %s2373_s25  ;;  %1171 = vrot.lane.b32.xlu0 %v1139_v46, %s2373_s25 }
 0x326   :  { %v1071_v32 = vpop.permute.xlu1 %1070  ;;  %v1077_v40 = vpop.permute.xlu0 %1076 }
 0x327   :  { %v1091_v49 = vsel %vm1088_vm5, %v1069_v35, %v1071_v32  ;;  %v1092_v50 = vsel %vm1088_vm5, %v1071_v32, %v1073_v37  ;;  %v2136_v32 = vld [vmem:[#allocation2 + $0x10] sm:$0xff] }
 0x328   :  { %v3213_v23 = vadd.f32 %v1091_v49, %v3122_v8  ;;  %v3216_v33 = vadd.f32 %v1092_v50, %v3124_v1  ;;  %v1002_v8 = vsel %vm997_vm4, %v3115_v43, %v3128_v13  ;;  %v1222_v1 = vmul.f32 %v3186_v59, %v2768_v24 }
 0x329   :  { %1177 = vrot.lane.b32.xlu1 %v1142_v57, %s2373_s25  ;;  %1175 = vrot.lane.b32.xlu0 %v1141_v3, %s2373_s25  ;;  %v1024_v36 = vadd.f32 %v1002_v8, %v3076_v53  ;;  %v1223_v43 = vmul.f32 %v3186_v59, %v2786_v25  ;;  %v1306_v59 = vld [vmem:[#allocation10 + $0x8] sm:$0xff]  ;;  %v2379_v49 = vmov 12   ;;  %v2381_v50 = vmov 15   ;;  %v2137_v57 = vld [vmem:[#allocation2] sm:$0xff] }
 0x32a   :  { %v3221_v42 = vpop.permute.xlu1 %1219  ;;  %v1081_v24 = vpop.permute.xlu0 %1080  ;;  %v1989_v3 = vcombine.high %v2137_v57, %v2137_v57 }
 0x32d   :  { %1309 = vperm.xlu1 %2112, %v1305_v55   ;;  %1246 = vrot.lane.b32.xlu0 %v1222_v1, %s2374_s22 }
 0x32e   :  { %v1075_v27 = vpop.permute.xlu1 %1074  ;;  %v1085_v41 = vpop.permute.xlu0 %1084 }
 0x32f   :  { %v1093_v52 = vsel %vm1088_vm5, %v1073_v37, %v1075_v27  ;;  %v3233_v54 = vadd.f32 %v1075_v27, %v1025_v60  ;;  %v1232_v37 = vmul.f32 %v3221_v42, %v2823_v9  ;;  %v1231_v9 = vmul.f32 %v3221_v42, %v2830_v4 }
 0x330   :  { %v3239_v35 = vadd.f32 %v1093_v52, %v1024_v36  ;;  %v2377_v4 = vmov 9  }
 0x331   :  { %1250 = vrot.lane.b32.xlu1 %v1224_v2, %s2374_s22  ;;  %1248 = vrot.lane.b32.xlu0 %v1223_v43, %s2374_s22 }
 0x332   :  { %v1079_v13 = vpop.permute.xlu1 %1078 }
 0x333   :  { %v1094_v53 = vsel %vm1088_vm5, %v1077_v40, %v1079_v13  ;;  %v1095_v0 = vsel %vm1088_vm5, %v1079_v13, %v1081_v24  ;;  %v1156_v40 = vpop.permute.xlu0 %1155 }
 0x334   :  { %v3250_v25 = vadd.f32 %v1094_v53, %v3131_v38  ;;  %v3253_v19 = vadd.f32 %v1095_v0, %v3135_v56 }
 0x335   :  { %1254 = vrot.lane.b32.xlu1 %v1226_v17, %s2374_s22  ;;  %1252 = vrot.lane.b32.xlu0 %v1225_v63, %s2374_s22 }
 0x336   :  { %v1083_v30 = vpop.permute.xlu1 %1082 }
 0x337   :  { %v1096_v11 = vsel %vm1088_vm5, %v1081_v24, %v1083_v30  ;;  %v1097_v16 = vsel %vm1088_vm5, %v1083_v30, %v1085_v41  ;;  %v1160_v55 = vpop.permute.xlu0 %1159 }
 0x338   :  { %v3264_v38 = vadd.f32 %v1096_v11, %v3137_v20  ;;  %v3267_v56 = vadd.f32 %v1097_v16, %v3144_v28  ;;  %v3763_v20 = vmov 4   ;;  %v3764_v28 = vmov 3  }
 0x339   :  { %1344 = vperm.xlu1 %2112, %v3257_v44   ;;  %1256 = vrot.lane.b32.xlu0 %v1227_v29, %s2374_s22 }
 0x33a   :  { %v1087_v22 = vpop.permute.xlu1 %1086 }
 0x33b   :  { %v1098_v14 = vsel %vm1088_vm5, %v1085_v41, %v1087_v22  ;;  %v3273_v46 = vadd.f32 %v1087_v22, %v3142_v45  ;;  %v1230_v45 = vmul.f32 %v3221_v42, %v2809_v61  ;;  %v1229_v61 = vmul.f32 %v3221_v42, %v2820_v62  ;;  %v1977_v62 = vld [vmem:[#allocation13] sm:$0xf]  ;;  %v1164_v8 = vpop.permute.xlu0 %1163 }
 0x33c   :  { %v3276_v51 = vadd.f32 %v1098_v14, %v3146_v48  ;;  %v3765_v48 = vmov 5  }
 0x33d   :  { %2114 = vset.pattern.permute.xlu1 %v3762_v18  ;;  %1378 = vperm.xlu0 %2113, %v3257_v44  }
 0x33e   :  { %1418 = vperm.xlu1 %2114, %v3257_v44   ;;  %v1158_v26 = vpop.permute.xlu1 %1157 }
 0x33f   :  { %v1180_v0 = vsel %vm1179_vm6, %v1156_v40, %v1158_v26  ;;  %v1181_v29 = vsel %vm1179_vm6, %v1158_v26, %v1160_v55  ;;  %v3767_v26 = vld [vmem:[#allocation24_spill] sm:$0xff] }
 0x340   :  { %v1202_v30 = vadd.f32 %v1180_v0, %v3200_v7 }
 0x341   :  { %2116 = vset.pattern.permute.xlu0 %v3763_v20 }
 0x342   :  { %2115 = vset.pattern.permute.xlu1 %v3764_v28  ;;  %1498 = vperm.xlu0 %2116, %v3257_v44   ;;  %v1162_v1 = vpop.permute.xlu1 %1161 }
 0x343   :  { %1458 = vperm.xlu1 %2115, %v3257_v44   ;;  %v1182_v22 = vsel %vm1179_vm6, %v1160_v55, %v1162_v1  ;;  %v1183_v14 = vsel %vm1179_vm6, %v1162_v1, %v1164_v8  ;;  %v3766_v55 = vld [vmem:[#allocation25_spill] sm:$0xff] }
 0x344   :  { %v1205_v7 = vadd.f32 %v1183_v14, %v3216_v33 }
 0x346   :  { %2119 = vset.pattern.permute.xlu0 %v2369_v21  ;;  %v1228_v21 = vmul.f32 %v3221_v42, %v2797_v10  ;;  %v1233_v10 = vmul.f32 %v3221_v42, %v2838_v12  ;;  %v2378_v12 = vmov 11   ;;  %v1991_v42 = vcombine.high %v2136_v32, %v2136_v32  ;;  %v1166_v27 = vpop.permute.xlu1 %1165 }
 0x347   :  { %2117 = vset.pattern.permute.xlu1 %v3761_v5  ;;  %1578 = vperm.xlu0 %2119, %v3257_v44   ;;  %v1207_v63 = vadd.f32 %v1166_v27, %v3233_v54  ;;  %v1184_v20 = vsel %vm1179_vm6, %v1164_v8, %v1166_v27  ;;  %v1203_v54 = vadd.f32 %v1181_v29, %v3203_v31  ;;  %v3768_v27 = vld [vmem:[#allocation27_spill] sm:$0xff] }
 0x348   :  { %1314 = vperm.xlu1 %2117, %v1306_v59  }
 0x34b   :  { %1262 = vrot.lane.b32.xlu0 %v1230_v45, %s2374_s22  ;;  %v1204_v45 = vadd.f32 %v1182_v22, %v3213_v23 }
 0x34c   :  { %2118 = vset.pattern.permute.xlu1 %v3765_v48  ;;  %2120 = vset.pattern.permute.xlu0 %v2370_v34  ;;  %v2375_v34 = vmov 10  }
 0x34d   :  { %1538 = vperm.xlu1 %2118, %v3257_v44  }
 0x34f   :  { %1266 = vrot.lane.b32.xlu0 %v1232_v37, %s2374_s22 }
 0x351   :  { %1258 = vrot.lane.b32.xlu1 %v1228_v21, %s2374_s22 }
 0x352   :  { %2121 = vset.pattern.permute.xlu1 %v2371_v58  ;;  %v2376_v58 = vmov 13  }
 0x353   :  { %1618 = vperm.xlu0 %2120, %v3257_v44  }
 0x355   :  { %1260 = vrot.lane.b32.xlu1 %v1229_v61, %s2374_s22 }
 0x357   :  { %2123 = vset.pattern.permute.xlu0 %v2375_v34 }
 0x358   :  { %1738 = vperm.xlu0 %2123, %v3257_v44  }
 0x359   :  { %1264 = vrot.lane.b32.xlu1 %v1231_v9, %s2374_s22 }
 0x35c   :  { %2126 = vset.pattern.permute.xlu0 %v2376_v58 }
 0x35d   :  { %1268 = vrot.lane.b32.xlu1 %v1233_v10, %s2374_s22  ;;  %1858 = vperm.xlu0 %2126, %v3257_v44   ;;  %v1206_v10 = vadd.f32 %v1184_v20, %v3239_v35 }
 0x361   :  { %1658 = vperm.xlu1 %2121, %v3257_v44   ;;  %2129 = vset.pattern.permute.xlu0 %v3761_v5  ;;  %v2380_v5 = vmov 14  }
 0x362   :  { %1980 = vperm.xlu0 %2129, %v1977_v62  }
 0x365   :  { %2122 = vset.pattern.permute.xlu1 %v2377_v4 }
 0x366   :  { %1698 = vperm.xlu1 %2122, %v3257_v44   ;;  %1996 = vrot.lane.b32.xlu0 %v2135_v47, %s2367_s9 }
 0x36a   :  { %2124 = vset.pattern.permute.xlu1 %v2378_v12  ;;  %2000 = vrot.lane.b32.xlu0 %v2136_v32, %s2367_s9 }
 0x36b   :  { %1778 = vperm.xlu1 %2124, %v3257_v44  }
 0x36f   :  { %2125 = vset.pattern.permute.xlu1 %v2379_v49 }
 0x370   :  { %1818 = vperm.xlu1 %2125, %v3257_v44  }
 0x374   :  { %2127 = vset.pattern.permute.xlu1 %v2380_v5 }
 0x375   :  { %1898 = vperm.xlu1 %2127, %v3257_v44  }
 0x379   :  { %2128 = vset.pattern.permute.xlu1 %v2381_v50 }
 0x37a   :  { %1938 = vperm.xlu1 %2128, %v3257_v44  }
 0x37e   :  { %1992 = vrot.lane.b32.xlu1 %v2137_v57, %s2367_s9 }
 0x382   :  { %1994 = vrot.lane.b32.xlu1 %v1989_v3, %s2367_s9 }
 0x386   :  { %1998 = vrot.lane.b32.xlu1 %v1990_v6, %s2367_s9 }
 0x38a   :  { %2002 = vrot.lane.b32.xlu1 %v1991_v42, %s2367_s9 }
 0x393   :  { %v1168_v60 = vpop.permute.xlu0 %1167  ;;  %v1170_v2 = vpop.permute.xlu1 %1169 }
 0x394   :  { %v1185_v48 = vsel %vm1179_vm6, %v1168_v60, %v1170_v2 }
 0x395   :  { %v3345_v23 = vadd.f32 %v1185_v48, %v3250_v25 }
 0x397   :  { %v1172_v36 = vpop.permute.xlu0 %1171  ;;  %v1174_v24 = vpop.permute.xlu1 %1173 }
 0x398   :  { %v1186_v21 = vsel %vm1179_vm6, %v1170_v2, %v1172_v36  ;;  %v1187_v61 = vsel %vm1179_vm6, %v1172_v36, %v1174_v24 }
 0x399   :  { %v3353_v12 = vadd.f32 %v1186_v21, %v3253_v19  ;;  %v3356_v32 = vadd.f32 %v1187_v61, %v3264_v38 }
 0x39b   :  { %v1176_v52 = vpop.permute.xlu0 %1175  ;;  %v1178_v17 = vpop.permute.xlu1 %1177 }
 0x39c   :  { %v1188_v58 = vsel %vm1179_vm6, %v1174_v24, %v1176_v52  ;;  %v1189_v33 = vsel %vm1179_vm6, %v1176_v52, %v1178_v17  ;;  %v3362_v25 = vadd.f32 %v1178_v17, %v3273_v46 }
 0x39d   :  { %v3359_v50 = vadd.f32 %v1188_v58, %v3267_v56  ;;  %v3367_v6 = vadd.f32 %v1189_v33, %v3276_v51 }
 0x39f   :  { %v1247_v43 = vpop.permute.xlu0 %1246 }
 0x3a3   :  { %v1249_v13 = vpop.permute.xlu0 %1248 }
 0x3a4   :  { %v1271_v41 = vsel %vm1270_vm7, %v1247_v43, %v1249_v13  ;;  %v3769_v43 = vld [vmem:[#allocation26_spill] sm:$0xff] }
 0x3a5   :  { %v1293_v18 = vadd.f32 %v1271_v41, %v1202_v30 }
 0x3a7   :  { %v1253_v53 = vpop.permute.xlu0 %1252 }
 0x3ab   :  { %v1257_v44 = vpop.permute.xlu0 %1256 }
 0x3ac   :  { %v1298_v11 = vadd.f32 %v1257_v44, %v1207_v63  ;;  %v1310_v16 = vpop.permute.xlu1 %1309 }
 0x3ad   :  { %v1317_v28 = vadd.f32 %v1310_v16, %v1293_v18 }
 0x3ae   :  { %v1322_v59 = vadd.f32 %v1310_v16, %v1298_v11 }
 0x3af   :  { %v3348_v4 = vmax.f32 %v1317_v28, 0.0 }
 0x3b0   :  { %v1251_v37 = vpop.permute.xlu1 %1250  ;;  %v3350_v47 = vmax.f32 %v1322_v59, 0.0 }
 0x3b1   :  { %v1272_v34 = vsel %vm1270_vm7, %v1249_v13, %v1251_v37  ;;  %v1273_v9 = vsel %vm1270_vm7, %v1251_v37, %v1253_v53  ;;  %v1350_v46 = vrot.slane %v3348_v4, %v3766_v55  ;;  %v1384_v8 = vrot.slane %v3348_v4, %v3767_v26 }
 0x3b2   :  { %v1294_v31 = vadd.f32 %v1272_v34, %v1203_v54  ;;  %v1295_v62 = vadd.f32 %v1273_v9, %v1204_v45  ;;  %v1370_v56 = vrot.slane %v3350_v47, %v3766_v55  ;;  %v1404_v51 = vrot.slane %v3350_v47, %v3767_v26 }
 0x3b3   :  { %v1444_v52 = vrot.slane %v3350_v47, %v3768_v27  ;;  %v1424_v2 = vrot.slane %v3348_v4, %v3768_v27  ;;  %v1504_v24 = vrot.slane %v3348_v4, %v3769_v43  ;;  %v1524_v13 = vrot.slane %v3350_v47, %v3769_v43 }
 0x3b4   :  { %v1318_v35 = vadd.f32 %v1310_v16, %v1294_v31  ;;  %v1319_v49 = vadd.f32 %v1310_v16, %v1295_v62  ;;  %v1255_v5 = vpop.permute.xlu1 %1254  ;;  %v1464_v41 = vrot.slane %v3348_v4, %v2608_v39  ;;  %v1564_v48 = vrot.slane %v3350_v47, %v2560_v15 }
 0x3b5   :  { %v1274_v57 = vsel %vm1270_vm7, %v1253_v53, %v1255_v5  ;;  %v1275_v3 = vsel %vm1270_vm7, %v1255_v5, %v1257_v44  ;;  %v1484_v53 = vrot.slane %v3350_v47, %v2608_v39 }
 0x3b6   :  { %v3369_v19 = vmax.f32 %v1318_v35, 0.0  ;;  %v1296_v38 = vadd.f32 %v1274_v57, %v1205_v7  ;;  %v1297_v40 = vadd.f32 %v1275_v3, %v1206_v10  ;;  %v3371_v42 = vmax.f32 %v1319_v49, 0.0 }
 0x3b8   :  { %v1320_v1 = vadd.f32 %v1310_v16, %v1296_v38  ;;  %v1321_v60 = vadd.f32 %v1310_v16, %v1297_v40  ;;  %v1345_v36 = vpop.permute.xlu1 %1344  ;;  %v1354_v63 = vrot.slane %v3369_v19, %v3766_v55  ;;  %v1358_v30 = vrot.slane %v3371_v42, %v3766_v55  ;;  %v3770_v16 = vld [vmem:[#allocation28_spill] sm:$0xff] }
 0x3b9   :  { %v1388_v44 = vrot.slane %v3369_v19, %v3767_v26  ;;  %v1392_v11 = vrot.slane %v3371_v42, %v3767_v26  ;;  %v1584_v29 = vrot.slane %v3348_v4, %v3770_v16  ;;  %v1604_v7 = vrot.slane %v3350_v47, %v3770_v16 }
 0x3ba   :  { %v3391_v0 = vmax.f32 %v1320_v1, 0.0  ;;  %v3393_v17 = vmax.f32 %v1321_v60, 0.0  ;;  %v1371_v37 = vmul.f32 %v1350_v46, %v1345_v36  ;;  %v1372_v21 = vmul.f32 %v1354_v63, %v1345_v36 }
 0x3bb   :  { %v1376_v61 = vmul.f32 %v1370_v56, %v1345_v36  ;;  %v1373_v9 = vmul.f32 %v1358_v30, %v1345_v36  ;;  %v1428_v58 = vrot.slane %v3369_v19, %v3768_v27  ;;  %v1432_v31 = vrot.slane %v3371_v42, %v3768_v27  ;;  %v3771_v30 = vld [vmem:[#allocation29_spill] sm:$0xff] }
 0x3bc   :  { %v1362_v22 = vrot.slane %v3391_v0, %v3766_v55  ;;  %v1366_v14 = vrot.slane %v3393_v17, %v3766_v55  ;;  %v1379_v18 = vpop.permute.xlu0 %1378  ;;  %v1396_v20 = vrot.slane %v3391_v0, %v3767_v26  ;;  %v1400_v28 = vrot.slane %v3393_v17, %v3767_v26 }
 0x3bd   :  { %v1405_v59 = vmul.f32 %v1384_v8, %v1379_v18  ;;  %v1406_v54 = vmul.f32 %v1388_v44, %v1379_v18  ;;  %v1419_v45 = vpop.permute.xlu1 %1418  ;;  %v1407_v34 = vmul.f32 %v1392_v11, %v1379_v18  ;;  %v1410_v10 = vmul.f32 %v1404_v51, %v1379_v18 }
 0x3be   :  { %v1374_v62 = vmul.f32 %v1362_v22, %v1345_v36  ;;  %v1375_v33 = vmul.f32 %v1366_v14, %v1345_v36  ;;  %v1408_v35 = vmul.f32 %v1396_v20, %v1379_v18  ;;  %v1409_v49 = vmul.f32 %v1400_v28, %v1379_v18 }
 0x3bf   :  { %v1411_v5 = vadd.f32 %v1405_v59, %v1371_v37  ;;  %v1412_v57 = vadd.f32 %v1406_v54, %v1372_v21  ;;  %v1436_v3 = vrot.slane %v3391_v0, %v3768_v27  ;;  %v1440_v38 = vrot.slane %v3393_v17, %v3768_v27 }
 0x3c0   :  { %v1413_v56 = vadd.f32 %v1407_v34, %v1373_v9  ;;  %v1445_v46 = vmul.f32 %v1424_v2, %v1419_v45  ;;  %v1446_v8 = vmul.f32 %v1428_v58, %v1419_v45  ;;  %v1447_v1 = vmul.f32 %v1432_v31, %v1419_v45 }
 0x3c1   :  { %v1499_v40 = vpop.permute.xlu0 %1498  ;;  %v1416_v51 = vadd.f32 %v1410_v10, %v1376_v61  ;;  %v1450_v63 = vmul.f32 %v1444_v52, %v1419_v45  ;;  %v1544_v36 = vrot.slane %v3348_v4, %v2560_v15  ;;  %v1414_v11 = vadd.f32 %v1408_v35, %v1374_v62 }
 0x3c2   :  { %v1459_v60 = vpop.permute.xlu1 %1458  ;;  %v1508_v22 = vrot.slane %v3369_v19, %v3769_v43  ;;  %v1512_v14 = vrot.slane %v3371_v42, %v3769_v43  ;;  %v1415_v18 = vadd.f32 %v1409_v49, %v1375_v33  ;;  %v1448_v20 = vmul.f32 %v1436_v3, %v1419_v45 }
 0x3c3   :  { %v1449_v28 = vmul.f32 %v1440_v38, %v1419_v45  ;;  %v1516_v52 = vrot.slane %v3391_v0, %v3769_v43  ;;  %v1451_v59 = vadd.f32 %v1445_v46, %v1411_v5  ;;  %v1452_v54 = vadd.f32 %v1446_v8, %v1412_v57 }
 0x3c4   :  { %v1453_v37 = vadd.f32 %v1447_v1, %v1413_v56  ;;  %v1520_v21 = vrot.slane %v3393_v17, %v3769_v43  ;;  %v1456_v34 = vadd.f32 %v1450_v63, %v1416_v51  ;;  %v1468_v9 = vrot.slane %v3369_v19, %v2608_v39 }
 0x3c5   :  { %v1472_v10 = vrot.slane %v3371_v42, %v2608_v39  ;;  %v1476_v45 = vrot.slane %v3391_v0, %v2608_v39  ;;  %v1454_v31 = vadd.f32 %v1448_v20, %v1414_v11  ;;  %v1480_v62 = vrot.slane %v3393_v17, %v2608_v39 }
 0x3c6   :  { %v3441_v61 = vpop.permute.xlu0 %1578  ;;  %v1485_v33 = vmul.f32 %v1464_v41, %v1459_v60  ;;  %v1490_v35 = vmul.f32 %v1484_v53, %v1459_v60  ;;  %v1455_v49 = vadd.f32 %v1449_v28, %v1415_v18  ;;  %v1486_v5 = vmul.f32 %v1468_v9, %v1459_v60 }
 0x3c7   :  { %v3449_v58 = vpop.permute.xlu1 %1314  ;;  %v1487_v57 = vmul.f32 %v1472_v10, %v1459_v60  ;;  %v1488_v3 = vmul.f32 %v1476_v45, %v1459_v60  ;;  %v1525_v38 = vmul.f32 %v1504_v24, %v1499_v40  ;;  %v1526_v56 = vmul.f32 %v1508_v22, %v1499_v40 }
 0x3c8   :  { %v1527_v46 = vmul.f32 %v1512_v14, %v1499_v40  ;;  %v1489_v8 = vmul.f32 %v1480_v62, %v1459_v60  ;;  %v1528_v51 = vmul.f32 %v1516_v52, %v1499_v40  ;;  %v1529_v63 = vmul.f32 %v1520_v21, %v1499_v40 }
 0x3c9   :  { %v1530_v41 = vmul.f32 %v1524_v13, %v1499_v40  ;;  %v1588_v53 = vrot.slane %v3369_v19, %v3770_v16  ;;  %v1491_v11 = vadd.f32 %v1485_v33, %v1451_v59  ;;  %v1496_v18 = vadd.f32 %v1490_v35, %v1456_v34 }
 0x3ca   :  { %v3459_v1 = vpop.permute.xlu0 %1262  ;;  %v1592_v20 = vrot.slane %v3371_v42, %v3770_v16  ;;  %v1596_v24 = vrot.slane %v3391_v0, %v3770_v16  ;;  %v1492_v22 = vadd.f32 %v1486_v5, %v1452_v54  ;;  %v1493_v14 = vadd.f32 %v1487_v57, %v1453_v37 }
 0x3cb   :  { %v1494_v28 = vadd.f32 %v1488_v3, %v1454_v31  ;;  %v1548_v52 = vrot.slane %v3369_v19, %v2560_v15  ;;  %v1495_v21 = vadd.f32 %v1489_v8, %v1455_v49  ;;  %v1552_v13 = vrot.slane %v3371_v42, %v2560_v15 }
 0x3cc   :  { %v1539_v60 = vpop.permute.xlu1 %1538  ;;  %v1556_v40 = vrot.slane %v3391_v0, %v2560_v15  ;;  %v1560_v59 = vrot.slane %v3393_v17, %v2560_v15  ;;  %v1600_v54 = vrot.slane %v3393_v17, %v3770_v16  ;;  %v1531_v45 = vadd.f32 %v1525_v38, %v1491_v11 }
 0x3cd   :  { %v1565_v37 = vmul.f32 %v1544_v36, %v1539_v60  ;;  %v1566_v9 = vmul.f32 %v1548_v52, %v1539_v60  ;;  %v1570_v10 = vmul.f32 %v1564_v48, %v1539_v60  ;;  %v1567_v31 = vmul.f32 %v1552_v13, %v1539_v60 }
 0x3ce   :  { %v3478_v34 = vpop.permute.xlu0 %1266  ;;  %v1568_v62 = vmul.f32 %v1556_v40, %v1539_v60  ;;  %v1569_v33 = vmul.f32 %v1560_v59, %v1539_v60  ;;  %v1605_v49 = vmul.f32 %v1584_v29, %v3441_v61  ;;  %v1532_v5 = vadd.f32 %v1526_v56, %v1492_v22 }
 0x3cf   :  { %v1533_v57 = vadd.f32 %v1527_v46, %v1493_v14  ;;  %v1536_v3 = vadd.f32 %v1530_v41, %v1496_v18  ;;  %v1606_v36 = vmul.f32 %v1588_v53, %v3441_v61  ;;  %v1534_v8 = vadd.f32 %v1528_v51, %v1494_v28 }
 0x3d0   :  { %v1259_v35 = vpop.permute.xlu1 %1258  ;;  %v1535_v52 = vadd.f32 %v1529_v63, %v1495_v21  ;;  %v1571_v2 = vadd.f32 %v1565_v37, %v1531_v45  ;;  %v1607_v48 = vmul.f32 %v1592_v20, %v3441_v61  ;;  %v1572_v38 = vadd.f32 %v1566_v9, %v1532_v5 }
 0x3d1   :  { %v1573_v11 = vadd.f32 %v1567_v31, %v1533_v57  ;;  %v1576_v13 = vadd.f32 %v1570_v10, %v1536_v3  ;;  %v1608_v60 = vmul.f32 %v1596_v24, %v3441_v61  ;;  %v1609_v40 = vmul.f32 %v1600_v54, %v3441_v61 }
 0x3d2   :  { %v1574_v59 = vadd.f32 %v1568_v62, %v1534_v8  ;;  %v1575_v44 = vadd.f32 %v1569_v33, %v1535_v52  ;;  %v1619_v29 = vpop.permute.xlu0 %1618  ;;  %v1610_v46 = vmul.f32 %v1604_v7, %v3441_v61  ;;  %v1628_v51 = vrot.slane %v3369_v19, %v3771_v30 }
 0x3d3   :  { %v1632_v63 = vrot.slane %v3371_v42, %v3771_v30  ;;  %v1636_v41 = vrot.slane %v3391_v0, %v3771_v30  ;;  %v1611_v53 = vadd.f32 %v1605_v49, %v1571_v2  ;;  %v1640_v18 = vrot.slane %v3393_v17, %v3771_v30 }
 0x3d4   :  { %v1261_v56 = vpop.permute.xlu1 %1260  ;;  %v1612_v22 = vadd.f32 %v1606_v36, %v1572_v38  ;;  %v1613_v7 = vadd.f32 %v1607_v48, %v1573_v11  ;;  %v1616_v61 = vadd.f32 %v1610_v46, %v1576_v13  ;;  %v3772_v19 = vrot.slane %v3348_v4, %v3771_v30 }
 0x3d5   :  { %v1276_v20 = vsel %vm1270_vm7, %v1259_v35, %v1261_v56  ;;  %v1277_v24 = vsel %vm1270_vm7, %v1261_v56, %v3459_v1  ;;  %v1614_v42 = vadd.f32 %v1608_v60, %v1574_v59  ;;  %v1615_v28 = vadd.f32 %v1609_v40, %v1575_v44 }
 0x3d6   :  { %v1645_v14 = vmul.f32 %v3772_v19, %v1619_v29  ;;  %v1299_v0 = vadd.f32 %v1276_v20, %v3345_v23  ;;  %v1300_v2 = vadd.f32 %v1277_v24, %v3353_v12  ;;  %v1646_v17 = vmul.f32 %v1628_v51, %v1619_v29 }
 0x3d7   :  { %v1647_v54 = vmul.f32 %v1632_v63, %v1619_v29  ;;  %v3521_v23 = vpop.permute.xlu0 %1738  ;;  %v1648_v12 = vmul.f32 %v1636_v41, %v1619_v29  ;;  %v1649_v31 = vmul.f32 %v1640_v18, %v1619_v29  ;;  %v3773_v62 = vrot.slane %v3350_v47, %v3771_v30 }
 0x3d8   :  { %v1265_v21 = vpop.permute.xlu1 %1264  ;;  %v1323_v10 = vadd.f32 %v3449_v58, %v1299_v0  ;;  %v1324_v4 = vadd.f32 %v3449_v58, %v1300_v2  ;;  %v1652_v3 = vadd.f32 %v1646_v17, %v1612_v22 }
 0x3d9   :  { %v1278_v37 = vsel %vm1270_vm7, %v3459_v1, %v1265_v21  ;;  %v1279_v9 = vsel %vm1270_vm7, %v1265_v21, %v3478_v34  ;;  %v1650_v33 = vmul.f32 %v3773_v62, %v1619_v29  ;;  %v1651_v1 = vadd.f32 %v1645_v14, %v1611_v53 }
 0x3da   :  { %v1301_v45 = vadd.f32 %v1278_v37, %v3356_v32  ;;  %v1302_v44 = vadd.f32 %v1279_v9, %v3359_v50  ;;  %v3526_v35 = vmax.f32 %v1323_v10, 0.0  ;;  %v3528_v49 = vmax.f32 %v1324_v4, 0.0 }
 0x3db   :  { %v1653_v50 = vadd.f32 %v1647_v54, %v1613_v7  ;;  %v1654_v11 = vadd.f32 %v1648_v12, %v1614_v42  ;;  %v1655_v40 = vadd.f32 %v1649_v31, %v1615_v28 }
 0x3dc   :  { %v1325_v5 = vadd.f32 %v3449_v58, %v1301_v45  ;;  %v1326_v57 = vadd.f32 %v3449_v58, %v1302_v44  ;;  %v1269_v32 = vpop.permute.xlu1 %1268  ;;  %v1744_v48 = vrot.slane %v3526_v35, %v3768_v27  ;;  %v1748_v38 = vrot.slane %v3528_v49, %v3768_v27  ;;  %v3551_v56 = vpop.permute.xlu0 %1858 }
 0x3dd   :  { %v1280_v36 = vsel %vm1270_vm7, %v3478_v34, %v1269_v32  ;;  %v1304_v8 = vadd.f32 %v1269_v32, %v3362_v25  ;;  %v1864_v34 = vrot.slane %v3526_v35, %v2560_v15  ;;  %v1656_v25 = vadd.f32 %v1650_v33, %v1616_v61 }
 0x3de   :  { %v3535_v52 = vmax.f32 %v1325_v5, 0.0  ;;  %v3537_v47 = vmax.f32 %v1326_v57, 0.0  ;;  %v1303_v13 = vadd.f32 %v1280_v36, %v3367_v6  ;;  %v1868_v6 = vrot.slane %v3528_v49, %v2560_v15 }
 0x3df   :  { %v1328_v60 = vadd.f32 %v3449_v58, %v1304_v8  ;;  %v1765_v53 = vmul.f32 %v1744_v48, %v3521_v23  ;;  %v1766_v18 = vmul.f32 %v1748_v38, %v3521_v23  ;;  %v3569_v7 = vmul.f32 %v1864_v34, %v3551_v56 }
 0x3e0   :  { %v1752_v59 = vrot.slane %v3535_v52, %v3768_v27  ;;  %v1756_v29 = vrot.slane %v3537_v47, %v3768_v27  ;;  %v1659_v46 = vpop.permute.xlu1 %1658  ;;  %v1327_v51 = vadd.f32 %v3449_v58, %v1303_v13  ;;  %v1872_v41 = vrot.slane %v3535_v52, %v2560_v15 }
 0x3e1   :  { %v3554_v63 = vmax.f32 %v1328_v60, 0.0  ;;  %v1876_v24 = vrot.slane %v3537_v47, %v2560_v15  ;;  %v1664_v61 = vrot.slane %v3526_v35, %v3766_v55  ;;  %v1668_v19 = vrot.slane %v3528_v49, %v3766_v55 }
 0x3e2   :  { %v1767_v20 = vmul.f32 %v1752_v59, %v3521_v23  ;;  %v1768_v22 = vmul.f32 %v1756_v29, %v3521_v23  ;;  %v3566_v58 = vmax.f32 %v1327_v51, 0.0  ;;  %v1672_v14 = vrot.slane %v3535_v52, %v3766_v55 }
 0x3e3   :  { %v1676_v42 = vrot.slane %v3537_v47, %v3766_v55  ;;  %v1684_v28 = vrot.slane %v3554_v63, %v3766_v55  ;;  %v3582_v0 = vmul.f32 %v1868_v6, %v3551_v56  ;;  %v3585_v2 = vmul.f32 %v1872_v41, %v3551_v56 }
 0x3e4   :  { %v1680_v21 = vrot.slane %v3566_v58, %v3766_v55  ;;  %v1685_v17 = vmul.f32 %v1664_v61, %v1659_v46  ;;  %v1686_v37 = vmul.f32 %v1668_v19, %v1659_v46  ;;  %v1687_v9 = vmul.f32 %v1672_v14, %v1659_v46 }
 0x3e5   :  { %v1699_v54 = vpop.permute.xlu1 %1698  ;;  %v1688_v10 = vmul.f32 %v1676_v42, %v1659_v46  ;;  %v1690_v4 = vmul.f32 %v1684_v28, %v1659_v46  ;;  %v1704_v12 = vrot.slane %v3526_v35, %v3767_v26  ;;  %v1708_v31 = vrot.slane %v3528_v49, %v3767_v26 }
 0x3e6   :  { %v1689_v45 = vmul.f32 %v1680_v21, %v1659_v46  ;;  %v1691_v44 = vadd.f32 %v1685_v17, %v1651_v1  ;;  %v1692_v62 = vadd.f32 %v1686_v37, %v1652_v3  ;;  %v1693_v33 = vadd.f32 %v1687_v9, %v1653_v50 }
 0x3e7   :  { %v1694_v5 = vadd.f32 %v1688_v10, %v1654_v11  ;;  %v1696_v57 = vadd.f32 %v1690_v4, %v1656_v25  ;;  %v1712_v55 = vrot.slane %v3535_v52, %v3767_v26  ;;  %v1716_v36 = vrot.slane %v3537_v47, %v3767_v26 }
 0x3e8   :  { %v1695_v32 = vadd.f32 %v1689_v45, %v1655_v40  ;;  %v1720_v1 = vrot.slane %v3566_v58, %v3767_v26  ;;  %v1724_v8 = vrot.slane %v3554_v63, %v3767_v26  ;;  %v1725_v48 = vmul.f32 %v1704_v12, %v1699_v54 }
 0x3e9   :  { %v1726_v38 = vmul.f32 %v1708_v31, %v1699_v54  ;;  %v1760_v3 = vrot.slane %v3566_v58, %v3768_v27  ;;  %v1727_v11 = vmul.f32 %v1712_v55, %v1699_v54  ;;  %v1728_v13 = vmul.f32 %v1716_v36, %v1699_v54 }
 0x3ea   :  { %v3603_v50 = vpop.permute.xlu1 %1778  ;;  %v1729_v60 = vmul.f32 %v1720_v1, %v1699_v54  ;;  %v1784_v34 = vrot.slane %v3526_v35, %v2608_v39  ;;  %v1730_v40 = vmul.f32 %v1724_v8, %v1699_v54  ;;  %v1731_v25 = vadd.f32 %v1725_v48, %v1691_v44 }
 0x3eb   :  { %v1732_v59 = vadd.f32 %v1726_v38, %v1692_v62  ;;  %v1769_v29 = vmul.f32 %v1760_v3, %v3521_v23  ;;  %v1733_v46 = vadd.f32 %v1727_v11, %v1693_v33  ;;  %v1734_v26 = vadd.f32 %v1728_v13, %v1694_v5 }
 0x3ec   :  { %v1735_v51 = vadd.f32 %v1729_v60, %v1695_v32  ;;  %v1788_v6 = vrot.slane %v3528_v49, %v2608_v39  ;;  %v3610_v41 = vadd.f32 %v1730_v40, %v1696_v57  ;;  %v1792_v19 = vrot.slane %v3535_v52, %v2608_v39  ;;  %v3654_v40 = vpop.permute.xlu0 %1980 }
 0x3ed   :  { %v1772_v61 = vadd.f32 %v1766_v18, %v1732_v59  ;;  %v1796_v14 = vrot.slane %v3537_v47, %v2608_v39  ;;  %v1773_v42 = vadd.f32 %v1767_v20, %v1733_v46  ;;  %v1774_v28 = vadd.f32 %v1768_v22, %v1734_v26 }
 0x3ee   :  { %v1775_v21 = vadd.f32 %v1769_v29, %v1735_v51  ;;  %v1800_v17 = vrot.slane %v3566_v58, %v2608_v39  ;;  %v1880_v37 = vrot.slane %v3566_v58, %v2560_v15  ;;  %v1771_v9 = vadd.f32 %v1765_v53, %v1731_v25 }
 0x3ef   :  { %v3618_v54 = vpop.permute.xlu1 %1818  ;;  %v1805_v18 = vmul.f32 %v1784_v34, %v3603_v50  ;;  %v1806_v10 = vmul.f32 %v1788_v6, %v3603_v50  ;;  %v1888_v4 = vmul.f32 %v1876_v24, %v3551_v56  ;;  %v1807_v45 = vmul.f32 %v1792_v19, %v3603_v50 }
 0x3f0   :  { %v1808_v20 = vmul.f32 %v1796_v14, %v3603_v50  ;;  %v1809_v22 = vmul.f32 %v1800_v17, %v3603_v50  ;;  %v1824_v31 = vrot.slane %v3526_v35, %v3769_v43  ;;  %v1828_v53 = vrot.slane %v3528_v49, %v3769_v43 }
 0x3f1   :  { %v1811_v44 = vadd.f32 %v1805_v18, %v1771_v9  ;;  %v1812_v12 = vadd.f32 %v1806_v10, %v1772_v61  ;;  %v1813_v62 = vadd.f32 %v1807_v45, %v1773_v42  ;;  %v1832_v24 = vrot.slane %v3535_v52, %v3769_v43 }
 0x3f2   :  { %v1814_v33 = vadd.f32 %v1808_v20, %v1774_v28  ;;  %v1815_v5 = vadd.f32 %v1809_v22, %v1775_v21  ;;  %v1889_v57 = vmul.f32 %v1880_v37, %v3551_v56  ;;  %v1836_v32 = vrot.slane %v3537_v47, %v3769_v43 }
 0x3f3   :  { %v1840_v55 = vrot.slane %v3566_v58, %v3769_v43  ;;  %v1845_v36 = vmul.f32 %v1824_v31, %v3618_v54  ;;  %v1846_v8 = vmul.f32 %v1828_v53, %v3618_v54  ;;  %v1847_v48 = vmul.f32 %v1832_v24, %v3618_v54 }
 0x3f4   :  { %v3640_v1 = vpop.permute.xlu1 %1898  ;;  %v1904_v38 = vrot.slane %v3526_v35, %v3770_v16  ;;  %v1908_v3 = vrot.slane %v3528_v49, %v3770_v16  ;;  %v1804_v11 = vrot.slane %v3554_v63, %v2608_v39  ;;  %v1848_v13 = vmul.f32 %v1836_v32, %v3618_v54 }
 0x3f5   :  { %v1849_v60 = vmul.f32 %v1840_v55, %v3618_v54  ;;  %v1944_v34 = vrot.slane %v3526_v35, %v3771_v30  ;;  %v1852_v25 = vadd.f32 %v1846_v8, %v1812_v12  ;;  %v1948_v46 = vrot.slane %v3528_v49, %v3771_v30 }
 0x3f6   :  { %v1925_v59 = vmul.f32 %v1904_v38, %v3640_v1  ;;  %v1926_v29 = vmul.f32 %v1908_v3, %v3640_v1  ;;  %v1851_v26 = vadd.f32 %v1845_v36, %v1811_v44  ;;  %v1853_v51 = vadd.f32 %v1847_v48, %v1813_v62 }
 0x3f7   :  { %v1854_v39 = vadd.f32 %v1848_v13, %v1814_v33  ;;  %v1912_v6 = vrot.slane %v3535_v52, %v3770_v16  ;;  %v1892_v19 = vadd.f32 %v3582_v0, %v1852_v25  ;;  %v1916_v35 = vrot.slane %v3537_v47, %v3770_v16 }
 0x3f8   :  { %v1952_v14 = vrot.slane %v3535_v52, %v3771_v30  ;;  %v1956_v42 = vrot.slane %v3537_v47, %v3771_v30  ;;  %v1891_v21 = vadd.f32 %v3569_v7, %v1851_v26  ;;  %v1893_v17 = vadd.f32 %v3585_v2, %v1853_v51  ;;  %v1997_v47 = vpop.permute.xlu0 %1996 }
 0x3f9   :  { %v1939_v61 = vpop.permute.xlu1 %1938  ;;  %v1932_v37 = vadd.f32 %v1926_v29, %v1892_v19  ;;  %v1894_v9 = vadd.f32 %v1888_v4, %v1854_v39  ;;  %v1927_v18 = vmul.f32 %v1912_v6, %v3640_v1  ;;  %v1928_v0 = vmul.f32 %v1916_v35, %v3640_v1 }
 0x3fa   :  { %v1965_v28 = vmul.f32 %v1944_v34, %v1939_v61  ;;  %v1966_v49 = vmul.f32 %v1948_v46, %v1939_v61  ;;  %v1931_v10 = vadd.f32 %v1925_v59, %v1891_v21  ;;  %v1967_v45 = vmul.f32 %v1952_v14, %v1939_v61 }
 0x3fb   :  { %v1968_v20 = vmul.f32 %v1956_v42, %v1939_v61  ;;  %v1764_v52 = vrot.slane %v3554_v63, %v3768_v27  ;;  %v1933_v12 = vadd.f32 %v1927_v18, %v1893_v17  ;;  %v1934_v31 = vadd.f32 %v1928_v0, %v1894_v9 }
 0x3fc   :  { %v1972_v44 = vadd.f32 %v1966_v49, %v1932_v37  ;;  %v1855_v7 = vadd.f32 %v1849_v60, %v1815_v5  ;;  %v1810_v2 = vmul.f32 %v1804_v11, %v3603_v50  ;;  %v1844_v4 = vrot.slane %v3554_v63, %v3769_v43  ;;  %v2001_v11 = vpop.permute.xlu0 %2000 }
 0x3fd   :  { %v1993_v22 = vpop.permute.xlu1 %1992  ;;  %v1971_v53 = vadd.f32 %v1965_v28, %v1931_v10  ;;  %v1770_v62 = vmul.f32 %v1764_v52, %v3521_v23  ;;  %v1973_v33 = vadd.f32 %v1967_v45, %v1933_v12  ;;  %v1974_v24 = vadd.f32 %v1968_v20, %v1934_v31 }
 0x3fe   :  { %v1895_v32 = vadd.f32 %v1889_v57, %v1855_v7  ;;  %v1920_v27 = vrot.slane %v3566_v58, %v3770_v16  ;;  %v1850_v55 = vmul.f32 %v1844_v4, %v3618_v54  ;;  %v1884_v5 = vrot.slane %v3554_v63, %v2560_v15 }
 0x3ff   :  { %v1776_v36 = vadd.f32 %v1770_v62, %v3610_v41  ;;  %v1984_v50 = vadd.f32 %v3654_v40, %v1972_v44  ;;  %v1983_v43 = vadd.f32 %v3654_v40, %v1971_v53  ;;  %v1924_v23 = vrot.slane %v3554_v63, %v3770_v16 }
 0x400   :  { %v1929_v57 = vmul.f32 %v1920_v27, %v3640_v1  ;;  %v1960_v41 = vrot.slane %v3566_v58, %v3771_v30  ;;  %v1964_v60 = vrot.slane %v3554_v63, %v3771_v30  ;;  %v1890_v16 = vmul.f32 %v1884_v5, %v3551_v56 }
 0x401   :  { %v1995_v8 = vpop.permute.xlu1 %1994  ;;  %v1816_v54 = vadd.f32 %v1810_v2, %v1776_v36  ;;  %v1930_v25 = vmul.f32 %v1924_v23, %v3640_v1  ;;  %v1985_v46 = vadd.f32 %v3654_v40, %v1973_v33  ;;  %v1986_v26 = vadd.f32 %v3654_v40, %v1974_v24 }
 0x402   :  { %v2004_v48 = vsel %vm906_vm3, %v1993_v22, %v1995_v8  ;;  %v2005_v38 = vsel %vm906_vm3, %v1995_v8, %v1997_v47  ;;  %v1935_v13 = vadd.f32 %v1929_v57, %v1895_v32  ;;  %v1969_v59 = vmul.f32 %v1960_v41, %v1939_v61 }
 0x403   :  { %v2015_v3 = vadd.f32 %v2004_v48, %v1983_v43  ;;  %v2016_v15 = vadd.f32 %v2005_v38, %v1984_v50  ;;  %v1856_v34 = vadd.f32 %v1850_v55, %v1816_v54  ;;  %v1970_v58 = vmul.f32 %v1964_v60, %v1939_v61 }
 0x404   :  { %v1975_v35 = vadd.f32 %v1969_v59, %v1935_v13 }
 0x405   :  { %v2027_v29 = vcombine.low %v2015_v3, %v2016_v15  ;;  %v1999_v51 = vpop.permute.xlu1 %1998  ;;  %v1896_v19 = vadd.f32 %v1890_v16, %v1856_v34 }
 0x406   :  { %v2006_v39 = vsel %vm906_vm3, %v1997_v47, %v1999_v51  ;;  %v2007_v6 = vsel %vm906_vm3, %v1999_v51, %v2001_v11  ;;  %v1987_v28 = vadd.f32 %v3654_v40, %v1975_v35 }
 0x407   :  { %2033 = vst [vmem:[#allocation16] sm:$0xff] %v2027_v29  ;;  %v2017_v30 = vadd.f32 %v2006_v39, %v1985_v46  ;;  %v2018_v63 = vadd.f32 %v2007_v6, %v1986_v26  ;;  %v1936_v56 = vadd.f32 %v1930_v25, %v1896_v19 }
 0x409   :  { %v2028_v14 = vcombine.low %v2017_v30, %v2018_v63  ;;  %v2003_v1 = vpop.permute.xlu1 %2002  ;;  %v1976_v42 = vadd.f32 %v1970_v58, %v1936_v56 }
 0x40a   :  { %v2008_v49 = vsel %vm906_vm3, %v2001_v11, %v2003_v1 }
 0x40b   :  { %2034 = vst [vmem:[#allocation16 + $0x8] sm:$0xff] %v2028_v14  ;;  %v1988_v61 = vadd.f32 %v3654_v40, %v1976_v42  ;;  %v2019_v21 = vadd.f32 %v2008_v49, %v1987_v28 }
 0x40d   :  { %v2020_v17 = vadd.f32 %v2003_v1, %v1988_v61 }
 0x40f   :  { %v2029_v37 = vcombine.low %v2019_v21, %v2020_v17 }
 0x411   :  { %2038 = vst.msk [vmem:[#allocation16 + $0x10] sm:$0xff] %vm2037_vm10, %v2029_v37 }
 0x412   :  { %2325 = shalt.err (!%p2322_p12)
}
 0x413   :  { %s2326_s17 = scalar_lea.hbm %s3725_s8, 384 }
 0x414   :  { %p2327_p13 = scmp.ne.s32.totalorder %s3725_s8, %s2326_s17  ;;  %p2330_p0 = scmp.lt.u32.totalorder %s2326_s17, %s3725_s8 }
 0x416   :  { %p2332_p1 = pnand %p2330_p0, %p2327_p13 }
 0x418   :  { %2335 = shalt.err (!%p2332_p1)
}
 0x419   :  { %2048 = dma.vmem_to_hbm [thread:$0]  %s2046_s11, 384, %s3725_s8, [#allocation4]  }
 0x41a   :  { %2346 = dma.done.wait [#allocation4], 384  }
 0x41b   :  { %2347 = vsyncadd [#allocation4], 4294966912 }
 0x41c   :  { %2052 = vsyncpa [#allocation3], 1 }
 0x41d   :  { %2053 = vsyncpa [#allocation6], 1 }
 0x41e   :  { %2054 = vsyncpa [#allocation9], 1 }
 0x41f   :  { %2055 = vsyncpa [#allocation12], 1 }
 0x420   :  { %2056 = vsyncpa [#allocation15], 1 }
 0x421   :  { %2057 = vsyncpa [#allocation4], 1 }

</bundles_post_ra>
